<compile_context>
chip_gen: v7x
topology: tpu7x:2x2x1
jax: 0.10.0
libtpu: 0.0.40
codegen_flags: <defaults>
</compile_context>

<pallas_src>
import functools

import numpy as np
import jax
import jax.numpy as jnp
from jax import lax
from jax.experimental import pallas as pl
from jax.experimental.pallas import tpu as pltpu


def _round_up(v, m):
    return (v + m - 1) // m * m


def _rgcn_layer_kernel(x_ref, mask_ref, w_ref, root_ref, bias_ref, out_ref,
                       *, src_chunk, apply_relu):
    d = pl.program_id(0)           # destination-node tile index ("parallel")
    r = pl.program_id(1)           # relation index ("arbitrary", innermost)
    nrel = pl.num_programs(1)

    npad, tdst = mask_ref.shape    # mask block: [src (all, sublanes), dst tile (lanes)]
    fin = x_ref.shape[1]
    n_chunks = npad // src_chunk
    neg_inf = jnp.float32(-jnp.inf)

    # aggr='max': running elementwise max over source-node chunks.  The live
    # intermediate is only (src_chunk, tdst, fin) and the reduction over the
    # leading (chunk) axis is pure VPU max, not a big XLU sublane reduce.
    def body(c, agg):
        s0 = pl.multiple_of(c * src_chunk, src_chunk)
        mc = mask_ref[pl.ds(s0, src_chunk), :].astype(jnp.float32)     # (tsrc, tdst)
        xc = x_ref[pl.ds(s0, src_chunk), :]                            # (tsrc, fin)
        cand = jnp.where(mc[:, :, None] > 0.5, xc[:, None, :], neg_inf)  # (tsrc, tdst, fin)
        return jnp.maximum(agg, jnp.max(cand, axis=0))

    agg = lax.fori_loop(0, n_chunks, body,
                        jnp.full((tdst, fin), neg_inf, jnp.float32),
                        unroll=(n_chunks <= 8))

    # PyG scatter-max semantics: destinations with no incoming edge of this
    # relation contribute 0 (pure VPU compare; valid since features are finite).
    agg = jnp.where(agg == neg_inf, jnp.float32(0.0), agg)

    # Per-relation transform; weights for all relations are resident in VMEM.
    contrib = jnp.dot(agg, w_ref[r], preferred_element_type=jnp.float32)

    @pl.when(r == 0)
    def _():
        # Initialize the resident output block with root transform + bias so the
        # last-relation epilogue only has to apply the ReLU.
        d0 = pl.multiple_of(d * tdst, tdst)
        xd = x_ref[pl.ds(d0, tdst), :]
        out_ref[...] = (jnp.dot(xd, root_ref[...], preferred_element_type=jnp.float32)
                        + bias_ref[...] + contrib)

    @pl.when(r > 0)
    def _():
        out_ref[...] += contrib

    if apply_relu:
        @pl.when(r == nrel - 1)
        def _():
            out_ref[...] = jnp.maximum(out_ref[...], 0.0)


def rgcn_conv_layer(x, rel_masks, rel_weight, root, bias, *, apply_relu,
                    dst_tile=128, agg_chunk_bytes=2 * 1024 * 1024):
    """One RGCNConv(aggr='max') layer.

    x:          (N, Fin) float32 node features
    rel_masks:  (R, N, N) int8 adjacency, rel_masks[r, dst, src] == 1 iff edge src->dst
    rel_weight: (R, Fin, Fout) dense per-relation weights
    root:       (Fin, Fout);  bias: (1, Fout)
    """
    n, fin = x.shape
    nrel = rel_masks.shape[0]
    fout = rel_weight.shape[-1]

    # --- tiling / lane-dense padding --------------------------------------
    tdst = min(dst_tile, _round_up(n, 8))     # dst rows per grid step
    npad = _round_up(n, tdst)                 # padded node count (dst and src)
    fin_p = _round_up(fin, 128)               # lane-dense feature dims
    fout_p = _round_up(fout, 128)

    # In-kernel source chunk: largest divisor of npad whose masked-select
    # intermediate (chunk, tdst, fin_p) f32 stays within the byte budget.
    src_chunk = 8
    for c in (128, 64, 32, 16, 8):
        if npad % c == 0 and c * tdst * fin_p * 4 <= agg_chunk_bytes:
            src_chunk = c
            break

    x_p = jnp.pad(x.astype(jnp.float32), ((0, npad - n), (0, fin_p - fin)))
    # store masks source-major [r, src, dst] so in-kernel chunking slices sublanes
    masks_sm = jnp.swapaxes(rel_masks, 1, 2).astype(jnp.int8)
    masks_p = jnp.pad(masks_sm, ((0, 0), (0, npad - n), (0, npad - n)))
    w_p = jnp.pad(rel_weight.astype(jnp.float32),
                  ((0, 0), (0, fin_p - fin), (0, fout_p - fout)))
    root_p = jnp.pad(root.astype(jnp.float32),
                     ((0, fin_p - fin), (0, fout_p - fout)))
    bias_p = jnp.pad(bias.astype(jnp.float32).reshape(1, fout),
                     ((0, 0), (0, fout_p - fout)))

    # --- VMEM budget hint ---------------------------------------------------
    est = (2 * npad * tdst                       # int8 mask block, double-buffered
           + 2 * npad * fin_p * 4                # x (resident)
           + 2 * nrel * fin_p * fout_p * 4       # all relation weights (resident)
           + 2 * (fin_p + 1) * fout_p * 4        # root + bias
           + 2 * tdst * fout_p * 4               # output block
           + 2 * src_chunk * tdst * fin_p * 4)   # aggregation intermediates
    vmem_limit = int(min(max(2 * est, 32 * 1024 * 1024), 56 * 1024 * 1024))

    kernel = functools.partial(_rgcn_layer_kernel,
                               src_chunk=src_chunk, apply_relu=apply_relu)
    out = pl.pallas_call(
        kernel,
        out_shape=jax.ShapeDtypeStruct((npad, fout_p), jnp.float32),
        grid_spec=pltpu.PrefetchScalarGridSpec(
            num_scalar_prefetch=0,
            grid=(npad // tdst, nrel),
            in_specs=[
                pl.BlockSpec((npad, fin_p), lambda d, r: (0, 0)),            # x (all nodes)
                pl.BlockSpec((None, npad, tdst), lambda d, r: (r, 0, d)),    # mask[r], dst tile
                pl.BlockSpec((nrel, fin_p, fout_p), lambda d, r: (0, 0, 0)),  # all W, resident
                pl.BlockSpec((fin_p, fout_p), lambda d, r: (0, 0)),          # root
                pl.BlockSpec((1, fout_p), lambda d, r: (0, 0)),              # bias
            ],
            out_specs=pl.BlockSpec((tdst, fout_p), lambda d, r: (d, 0)),
        ),
        compiler_params=pltpu.CompilerParams(
            dimension_semantics=("parallel", "arbitrary"),
            vmem_limit_bytes=vmem_limit),
    )(x_p, masks_p, w_p, root_p, bias_p)
    return out[:n, :fout]


def block_diag_weights(blocks):
    """(R, nb, cin, cout) block weights -> dense block-diagonal (R, nb*cin, nb*cout)."""
    nrel, nb, cin, cout = blocks.shape
    w = jnp.zeros((nrel, nb * cin, nb * cout), jnp.float32)
    for b in range(nb):
        w = w.at[:, b * cin:(b + 1) * cin, b * cout:(b + 1) * cout].set(blocks[:, b])
    return w


def rgcn_forward(x, rel_masks, params):
    """Full RGCN forward (inference mode)."""
    n_layers = len(params)
    for i, p in enumerate(params):
        x = rgcn_conv_layer(x, rel_masks, p["rel_weight"], p["root"], p["bias"],
                            apply_relu=(i < n_layers - 1))
        # TODO(synk): F.dropout(p=0.4, training=self.training) is identity at
        # inference; training-mode dropout is not implemented here.
    return x


def rgcn_reference(x, rel_masks, params):
    """Pure-JAX reference with identical semantics (for the correctness check)."""
    n_layers = len(params)
    nrel = rel_masks.shape[0]
    for i, p in enumerate(params):
        out = x @ p["root"] + p["bias"]
        for r in range(nrel):
            m = rel_masks[r].astype(jnp.float32)
            msgs = jnp.where(m[:, :, None] > 0.5, x[None, :, :], -jnp.inf)
            agg = jnp.max(msgs, axis=1)
            agg = jnp.where(jnp.sum(m, axis=1, keepdims=True) > 0.5, agg, 0.0)
            out = out + agg @ p["rel_weight"][r]
        if i < n_layers - 1:
            out = jnp.maximum(out, 0.0)
        x = out
    return x


if __name__ == "__main__":
    key = jax.random.PRNGKey(0)
    N = 32            # nodes
    E = 96            # edges
    R = 4             # num_relations (len(hgraph.edge_types))
    n_bases = 4       # args.n_bases
    in_ch, hid_ch, out_ch = 16, 32, 8   # in/hidden/out channels, n_layers=2

    keys = jax.random.split(key, 12)
    x = jax.random.normal(keys[0], (N, in_ch), jnp.float32)
    src = jax.random.randint(keys[1], (E,), 0, N)
    dst = jax.random.randint(keys[2], (E,), 0, N)
    edge_index = jnp.stack([src, dst])                       # (2, E)
    edge_type = jax.random.randint(keys[3], (E,), 0, R)      # (E,)

    # densify sparse edge list into per-relation int8 adjacency: mask[r, dst, src]
    rel_masks = jnp.zeros((R, N, N), jnp.int8)
    rel_masks = rel_masks.at[edge_type, edge_index[1], edge_index[0]].set(1)

    def glorot(k, shape):
        fan = shape[-2] + shape[-1]
        return jax.random.normal(k, shape, jnp.float32) * jnp.sqrt(2.0 / fan)

    # layer 0: RGCNConv(in_ch, hid_ch, R, num_blocks=n_bases, aggr='max')
    blocks0 = glorot(keys[4], (R, n_bases, in_ch // n_bases, hid_ch // n_bases))
    layer0 = dict(
        rel_weight=block_diag_weights(blocks0),              # (R, in_ch, hid_ch)
        root=glorot(keys[5], (in_ch, hid_ch)),
        bias=0.1 * jax.random.normal(keys[9], (1, hid_ch), jnp.float32),
    )

    # layer 1: RGCNConv(hid_ch, out_ch, R, num_bases=n_bases, aggr='max')
    basis = glorot(keys[6], (n_bases, hid_ch, out_ch))
    comp = glorot(keys[7], (R, n_bases))
    rel_w1 = (comp @ basis.reshape(n_bases, -1)).reshape(R, hid_ch, out_ch)
    layer1 = dict(
        rel_weight=rel_w1,                                   # (R, hid_ch, out_ch)
        root=glorot(keys[8], (hid_ch, out_ch)),
        bias=0.1 * jax.random.normal(keys[10], (1, out_ch), jnp.float32),
    )

    params = [layer0, layer1]

    y = rgcn_forward(x, rel_masks, params)
    y = jax.block_until_ready(y)

    y_ref = rgcn_reference(x, rel_masks, params)
    np.testing.assert_allclose(np.asarray(y), np.asarray(y_ref), rtol=2e-3, atol=2e-3)

    print("KERNEL_OK")
</pallas_src>

<mosaic_0001>
module attributes {stable_mosaic.version = 11 : i64} {
  func.func @_rgcn_layer_kernel(%arg0: i32, %arg1: i32, %arg2: memref<32x128xf32, #tpu.memory_space<vmem>>, %arg3: memref<1x32x32xi8, #tpu.memory_space<vmem>>, %arg4: memref<4x128x128xf32, #tpu.memory_space<vmem>>, %arg5: memref<128x128xf32, #tpu.memory_space<vmem>>, %arg6: memref<1x128xf32, #tpu.memory_space<vmem>>, %arg7: memref<32x128xf32, #tpu.memory_space<vmem>>) attributes {dimension_semantics = [#tpu.dimension_semantics<parallel>, #tpu.dimension_semantics<arbitrary>], iteration_bounds = array<i64: 1, 4>, scalar_prefetch = 0 : i64, scratch_operands = 0 : i64, tpu.core_type = #tpu.core_type<tc>, window_params = [{pipeline_mode = #tpu.pipeline_mode<synchronous>, transform_indices = @transform_0, window_bounds = array<i64: 32, 128>}, {transform_indices = @transform_1, window_bounds = array<i64: 1, 32, 32>}, {pipeline_mode = #tpu.pipeline_mode<synchronous>, transform_indices = @transform_2, window_bounds = array<i64: 4, 128, 128>}, {pipeline_mode = #tpu.pipeline_mode<synchronous>, transform_indices = @transform_3, window_bounds = array<i64: 128, 128>}, {pipeline_mode = #tpu.pipeline_mode<synchronous>, transform_indices = @transform_4, window_bounds = array<i64: 1, 128>}, {transform_indices = @transform_5, window_bounds = array<i64: 32, 128>}]} {
    %cst = arith.constant 0xFF800000 : f32
    %0 = vector.broadcast %cst : f32 to vector<32x128xf32>
    %cst_0 = arith.constant 0xFF800000 : f32
    %c0_i32 = arith.constant 0 : i32
    %c32_i32 = arith.constant 32 : i32
    %1 = arith.muli %c0_i32, %c32_i32 : i32
    %2 = tpu.assume_multiple %1, 32 : i32
    %c0 = arith.constant 0 : index
    %3 = arith.index_cast %2 : i32 to index
    %c0_1 = arith.constant 0 : index
    %4 = vector.load %arg3[%c0, %3, %c0_1] : memref<1x32x32xi8, #tpu.memory_space<vmem>>, vector<1x32x32xi8>
    %5 = vector.shape_cast %4 : vector<1x32x32xi8> to vector<32x32xi8>
    %6 = arith.sitofp %5 : vector<32x32xi8> to vector<32x32xf32>
    %7 = arith.index_cast %2 : i32 to index
    %c0_2 = arith.constant 0 : index
    %8 = vector.load %arg2[%7, %c0_2] : memref<32x128xf32, #tpu.memory_space<vmem>>, vector<32x128xf32>
    %9 = vector.shape_cast %6 : vector<32x32xf32> to vector<32x32x1xf32>
    %cst_3 = arith.constant 5.000000e-01 : f32
    %10 = vector.broadcast %cst_3 : f32 to vector<32x32x1xf32>
    %11 = arith.cmpf ogt, %9, %10 : vector<32x32x1xf32>
    %12 = vector.shape_cast %8 : vector<32x128xf32> to vector<32x1x128xf32>
    %13 = vector.shape_cast %11 : vector<32x32x1xi1> to vector<32x32x1xi1>
    %14 = vector.broadcast %13 : vector<32x32x1xi1> to vector<32x32x128xi1>
    %15 = vector.shape_cast %12 : vector<32x1x128xf32> to vector<32x1x128xf32>
    %16 = vector.broadcast %15 : vector<32x1x128xf32> to vector<32x32x128xf32>
    %17 = vector.broadcast %cst_0 : f32 to vector<32x32x128xf32>
    %18 = arith.select %14, %16, %17 : vector<32x32x128xi1>, vector<32x32x128xf32>
    %cst_4 = arith.constant dense<0xFF800000> : vector<32x128xf32>
    %19 = vector.multi_reduction <maximumf>, %18, %cst_4 [0] : vector<32x32x128xf32> to vector<32x128xf32>
    %20 = arith.maximumf %0, %19 : vector<32x128xf32>
    %c1_i32 = arith.constant 1 : i32
    %cst_5 = arith.constant 0xFF800000 : f32
    %21 = vector.broadcast %cst_5 : f32 to vector<32x128xf32>
    %22 = arith.cmpf oeq, %20, %21 : vector<32x128xf32>
    %cst_6 = arith.constant 0.000000e+00 : f32
    %23 = vector.broadcast %cst_6 : f32 to vector<32x128xf32>
    %24 = arith.select %22, %23, %20 : vector<32x128xi1>, vector<32x128xf32>
    %25 = arith.index_cast %arg1 : i32 to index
    %c0_7 = arith.constant 0 : index
    %c0_8 = arith.constant 0 : index
    %26 = vector.load %arg4[%25, %c0_7, %c0_8] : memref<4x128x128xf32, #tpu.memory_space<vmem>>, vector<1x128x128xf32>
    %27 = vector.shape_cast %26 : vector<1x128x128xf32> to vector<128x128xf32>
    %cst_9 = arith.constant dense<0.000000e+00> : vector<32x128xf32>
    %28 = tpu.matmul %24, %27, %cst_9 {dimension_numbers = #tpu.dot_dimension_numbers<[1], [0], [0], [1], [0, 0, 1, 1], [], []>} : vector<32x128xf32>, vector<128x128xf32>, vector<32x128xf32> -> vector<32x128xf32>
    %c0_i32_10 = arith.constant 0 : i32
    %29 = arith.cmpi eq, %arg1, %c0_i32_10 : i32
    %30 = arith.extui %29 : i1 to i32
    %c0_i32_11 = arith.constant 0 : i32
    %31 = arith.cmpi ne, %30, %c0_i32_11 : i32
    scf.if %31 {
      %c32_i32_15 = arith.constant 32 : i32
      %38 = arith.muli %arg0, %c32_i32_15 : i32
      %39 = tpu.assume_multiple %38, 32 : i32
      %40 = arith.index_cast %39 : i32 to index
      %c0_16 = arith.constant 0 : index
      %41 = vector.load %arg2[%40, %c0_16] : memref<32x128xf32, #tpu.memory_space<vmem>>, vector<32x128xf32>
      %c0_17 = arith.constant 0 : index
      %c0_18 = arith.constant 0 : index
      %42 = vector.load %arg5[%c0_17, %c0_18] : memref<128x128xf32, #tpu.memory_space<vmem>>, vector<128x128xf32>
      %cst_19 = arith.constant dense<0.000000e+00> : vector<32x128xf32>
      %43 = tpu.matmul %41, %42, %cst_19 {dimension_numbers = #tpu.dot_dimension_numbers<[1], [0], [0], [1], [0, 0, 1, 1], [], []>} : vector<32x128xf32>, vector<128x128xf32>, vector<32x128xf32> -> vector<32x128xf32>
      %c0_20 = arith.constant 0 : index
      %c0_21 = arith.constant 0 : index
      %44 = vector.load %arg6[%c0_20, %c0_21] : memref<1x128xf32, #tpu.memory_space<vmem>>, vector<1x128xf32>
      %45 = vector.broadcast %44 : vector<1x128xf32> to vector<32x128xf32>
      %46 = arith.addf %43, %45 : vector<32x128xf32>
      %47 = arith.addf %46, %28 : vector<32x128xf32>
      %c0_22 = arith.constant 0 : index
      %c0_23 = arith.constant 0 : index
      %48 = vector.load %arg7[%c0_22, %c0_23] : memref<32x128xf32, #tpu.memory_space<vmem>>, vector<32x128xf32>
      tpu.vector_store %arg7[%c0_22, %c0_23], %47 {strides = array<i32>} : memref<32x128xf32, #tpu.memory_space<vmem>>, vector<32x128xf32>,
    } else {
    }
    %c0_i32_12 = arith.constant 0 : i32
    %32 = arith.cmpi sgt, %arg1, %c0_i32_12 : i32
    %33 = arith.extui %32 : i1 to i32
    %c0_i32_13 = arith.constant 0 : i32
    %34 = arith.cmpi ne, %33, %c0_i32_13 : i32
    scf.if %34 {
      %c0_15 = arith.constant 0 : index
      %c0_16 = arith.constant 0 : index
      %38 = vector.load %arg7[%c0_15, %c0_16] : memref<32x128xf32, #tpu.memory_space<vmem>>, vector<32x128xf32>
      %39 = arith.addf %38, %28 : vector<32x128xf32>
      %c0_17 = arith.constant 0 : index
      %c0_18 = arith.constant 0 : index
      %40 = vector.load %arg7[%c0_17, %c0_18] : memref<32x128xf32, #tpu.memory_space<vmem>>, vector<32x128xf32>
      tpu.vector_store %arg7[%c0_17, %c0_18], %39 {strides = array<i32>} : memref<32x128xf32, #tpu.memory_space<vmem>>, vector<32x128xf32>,
    } else {
    }
    %c3_i32 = arith.constant 3 : i32
    %35 = arith.cmpi eq, %arg1, %c3_i32 : i32
    %36 = arith.extui %35 : i1 to i32
    %c0_i32_14 = arith.constant 0 : i32
    %37 = arith.cmpi ne, %36, %c0_i32_14 : i32
    scf.if %37 {
      %c0_15 = arith.constant 0 : index
      %c0_16 = arith.constant 0 : index
      %38 = vector.load %arg7[%c0_15, %c0_16] : memref<32x128xf32, #tpu.memory_space<vmem>>, vector<32x128xf32>
      %cst_17 = arith.constant 0.000000e+00 : f32
      %39 = vector.broadcast %cst_17 : f32 to vector<32x128xf32>
      %40 = arith.maximumf %38, %39 : vector<32x128xf32>
      %c0_18 = arith.constant 0 : index
      %c0_19 = arith.constant 0 : index
      %41 = vector.load %arg7[%c0_18, %c0_19] : memref<32x128xf32, #tpu.memory_space<vmem>>, vector<32x128xf32>
      tpu.vector_store %arg7[%c0_18, %c0_19], %40 {strides = array<i32>} : memref<32x128xf32, #tpu.memory_space<vmem>>, vector<32x128xf32>,
    } else {
    }
    return
  }
  func.func @transform_0(%arg0: i32, %arg1: i32) -> (i32, i32) {
    %c0_i32 = arith.constant 0 : i32
    %c0_i32_0 = arith.constant 0 : i32
    %c0_i32_1 = arith.constant 0 : i32
    return %c0_i32, %c0_i32_0 : i32, i32
  }
  func.func @transform_1(%arg0: i32, %arg1: i32) -> (i32, i32, i32) {
    %c0_i32 = arith.constant 0 : i32
    %c0_i32_0 = arith.constant 0 : i32
    return %arg1, %c0_i32, %arg0 : i32, i32, i32
  }
  func.func @transform_2(%arg0: i32, %arg1: i32) -> (i32, i32, i32) {
    %c0_i32 = arith.constant 0 : i32
    %c0_i32_0 = arith.constant 0 : i32
    %c0_i32_1 = arith.constant 0 : i32
    %c0_i32_2 = arith.constant 0 : i32
    return %c0_i32, %c0_i32_0, %c0_i32_1 : i32, i32, i32
  }
  func.func @transform_3(%arg0: i32, %arg1: i32) -> (i32, i32) {
    %c0_i32 = arith.constant 0 : i32
    %c0_i32_0 = arith.constant 0 : i32
    %c0_i32_1 = arith.constant 0 : i32
    return %c0_i32, %c0_i32_0 : i32, i32
  }
  func.func @transform_4(%arg0: i32, %arg1: i32) -> (i32, i32) {
    %c0_i32 = arith.constant 0 : i32
    %c0_i32_0 = arith.constant 0 : i32
    %c0_i32_1 = arith.constant 0 : i32
    return %c0_i32, %c0_i32_0 : i32, i32
  }
  func.func @transform_5(%arg0: i32, %arg1: i32) -> (i32, i32) {
    %c0_i32 = arith.constant 0 : i32
    %c0_i32_0 = arith.constant 0 : i32
    return %arg0, %c0_i32 : i32, i32
  }
}

</mosaic_0001>

<bundles_post_ra>
// kernel: tpu_custom_call.1
= control target key start
LH: loop header
LB: loop body
LE: loop exit
PB: predicated region body
PF: predicated region fallthrough
CT: control target
= control target key end

     0   :  { %10 = vsyncpa [#allocation3], 0  ;;  %s3492_s0 = inlined_call_operand.hbm [shape: f32[32,128], index: 0, kind: input, shape index: {}]   ;;  %s3493_s1 = inlined_call_operand.hbm [shape: s8[4,32,32], index: 1, kind: input, shape index: {}]   ;;  %s3494_s2 = inlined_call_operand.hbm [shape: f32[4,128,128], index: 2, kind: input, shape index: {}]   ;;  %s3495_s3 = inlined_call_operand.hbm [shape: f32[128,128], index: 3, kind: input, shape index: {}]   ;;  %s3496_s4 = inlined_call_operand.vmem [shape: f32[1,128], index: 4, kind: input, shape index: {}]   ;;  %s3497_s5 = inlined_call_operand.hbm [shape: f32[32,128], index: 5, kind: output, shape index: {}]  }
   0x1   :  { %11 = vsyncpa [#allocation6], 0 }
   0x2   :  { %13 = vsyncpa [#allocation6 + $0x1], 0 }
   0x3   :  { %14 = vsyncpa [#allocation9], 0 }
   0x4   :  { %15 = vsyncpa [#allocation4], 0  ;;  %s2880_s18 = smov 0   ;;  %s2882_s19 = smov 0  }
   0x5   :  { %s2884_s20 = smov 0   ;;  %s2886_s21 = smov 0  }
   0x6   :  { %s2888_s22 = smov 0   ;;  %s2890_s23 = smov 0  }
   0x7 LB: > { %s2909_s24 = sadd.s32 4294967295, %s2838_s23   ;;  %p76_p0 = scmp.ne.s32.totalorder %s2822_s19, %s2818_s18  ;;  %s2838_s23 = sphi %s2890_s23, %s21_s23   ;;  %s2834_s22 = sphi %s2888_s22, %s3518_s22   ;;  %s2830_s21 = sphi %s2886_s21, %s3517_s21   ;;  %s2826_s20 = sphi %s2884_s20, %s3516_s20   ;;  %s2822_s19 = sphi %s2882_s19, %s3515_s19   ;;  %s2818_s18 = sphi %s2880_s18, %s3514_s18  }
   0x8   : > { %p3498_p1 = scmp.eq.s32.totalorder %s2909_s24, 0  ;;  %p2289_p2 = scmp.ge.s32.totalorder %s2838_s23, 1 }
   0x9   : > { %p176_p3 = scmp.lt.s32.totalorder %s2838_s23, 5  ;;  %s2840_s27 = smov [#allocation7]  }
   0xa   : > { %p2917_p4 = por %p3498_p1, %p76_p0  ;;  %s201_s28 = sshll.u32 %s2840_s27, 4  ;;  %s202_s28 = int_to_ptr.vmem [resolvable:$true] %s201_s28 }
   0xb   : > { %p2921_p5 = pnand %p2289_p2, %p176_p3  ;;  %s2841_s30 = smov [#allocation2]  }
   0xc   : > { %s3501_s25 = scalar_select %p2917_p4, 1, 0 }
   0xd   : > { %s3502_s26 = scalar_select %p2921_p5, 1, 0 }
   0xe   : > { %p2548_p6 = pneg %p2921_p5  ;;  %s188_s6 = sshll.u32 %s2841_s30, 4  ;;  %s189_s6 = int_to_ptr.vmem [resolvable:$true] %s188_s6 }
   0xf   : > { %s2632_s9 = scalar_lea.hbm %s3494_s2, 8192 }
  0x10   : > { %p2929_p7 = pnand %p2548_p6, %p3498_p1  ;;  %p2633_p8 = scmp.ne.s32.totalorder %s3494_s2, %s2632_s9 }
  0x11   : > { %p2639_p12 = scmp.lt.u32.totalorder %s2632_s9, %s3494_s2 }
  0x12   : > { %p2941_p9 = pneg %p2929_p7 }
  0x14   : > { %p2635_p10 = pnand %p2941_p9, %p2633_p8 }
  0x16   : > { %p2636_p11 = pneg %p2635_p10 }
  0x18   : > { %p2641_p13 = pnand %p2639_p12, %p2636_p11 }
  0x1a   : > { %2644 = shalt.err (!%p2641_p13)
}
  0x1b   : > { %s2645_s15 = scalar_lea.vmem %s202_s28, 8192  ;;  %p2653_p6 = scmp.lt.s32.totalorder %s202_s28, %s202_s28 }
  0x1c   : > { %p2646_p0 = scmp.ne.s32.totalorder %s202_s28, %s2645_s15  ;;  %p2654_p1 = scmp.lt.s32.totalorder %s2645_s15, %s2645_s15 }
  0x1e   : > { %p2648_p2 = pnand %p2646_p0, %p2941_p9  ;;  %p2655_p4 = por %p2654_p1, %p2653_p6 }
  0x20   : > { %p2649_p3 = pneg %p2648_p2 }
  0x22   : > { %p2656_p5 = pnand %p2655_p4, %p2649_p3 }
  0x24   : > { %2659 = shalt.err (!%p2656_p5)
}
  0x25   : > { %s2842_s16 = smov 128   ;;  %s2843_s17 = smov 8  }
  0x26   : > { %2554 = dma.hbm_to_vmem [thread:$0]  (!%p2929_p7), %s3494_s2, 8192, %s202_s28, [#allocation6], %s2842_s16, %s2842_s16, %s2843_s17  }
  0x27   : > { %s2844_s30 = smov [#allocation8]   ;;  %s2660_s10 = scalar_lea.hbm %s3492_s0, 512 }
  0x28   : > { %s214_s7 = sshll.u32 %s2844_s30, 4  ;;  %p2661_p1 = scmp.ne.s32.totalorder %s3492_s0, %s2660_s10  ;;  %s215_s7 = int_to_ptr.vmem [resolvable:$true] %s214_s7 }
  0x29   : > { %p2667_p8 = scmp.lt.u32.totalorder %s2660_s10, %s3492_s0 }
  0x2a   : > { %p2663_p4 = pnand %p2661_p1, %p2941_p9 }
  0x2c   : > { %p2664_p5 = pneg %p2663_p4 }
  0x2e   : > { %p2669_p10 = pnand %p2667_p8, %p2664_p5 }
  0x30   : > { %2672 = shalt.err (!%p2669_p10)
}
  0x31   : > { %s2673_s28 = scalar_lea.vmem %s189_s6, 512  ;;  %p2681_p0 = scmp.lt.s32.totalorder %s189_s6, %s189_s6 }
  0x32   : > { %p2674_p11 = scmp.ne.s32.totalorder %s189_s6, %s2673_s28  ;;  %p2682_p2 = scmp.lt.s32.totalorder %s2673_s28, %s2673_s28 }
  0x34   : > { %p2676_p12 = pnand %p2674_p11, %p2941_p9  ;;  %p2683_p3 = por %p2682_p2, %p2681_p0 }
  0x36   : > { %p2677_p13 = pneg %p2676_p12 }
  0x38   : > { %p2684_p6 = pnand %p2683_p3, %p2677_p13 }
  0x3a   : > { %2687 = shalt.err (!%p2684_p6)
}
  0x3b   : > { %2551 = dma.hbm_to_vmem [thread:$0]  (!%p2929_p7), %s3492_s0, 512, %s189_s6, [#allocation3], %s2842_s16, %s2842_s16, %s2843_s17  }
  0x3c   : > { %s2688_s9 = scalar_lea.hbm %s3495_s3, 2048 }
  0x3d   : > { %p2689_p1 = scmp.ne.s32.totalorder %s3495_s3, %s2688_s9  ;;  %p2695_p8 = scmp.lt.u32.totalorder %s2688_s9, %s3495_s3 }
  0x3f   : > { %p2691_p4 = pnand %p2689_p1, %p2941_p9 }
  0x41   : > { %p2692_p5 = pneg %p2691_p4 }
  0x43   : > { %p2697_p10 = pnand %p2695_p8, %p2692_p5 }
  0x45   : > { %2700 = shalt.err (!%p2697_p10)
}
  0x46   : > { %s2701_s15 = scalar_lea.vmem %s215_s7, 2048  ;;  %p2709_p0 = scmp.lt.s32.totalorder %s215_s7, %s215_s7 }
  0x47   : > { %p2702_p11 = scmp.ne.s32.totalorder %s215_s7, %s2701_s15  ;;  %p2710_p2 = scmp.lt.s32.totalorder %s2701_s15, %s2701_s15 }
  0x49   : > { %p2704_p12 = pnand %p2702_p11, %p2941_p9  ;;  %p2711_p3 = por %p2710_p2, %p2709_p0 }
  0x4b   : > { %p2705_p13 = pneg %p2704_p12 }
  0x4d   : > { %p2712_p6 = pnand %p2711_p3, %p2705_p13 }
  0x4f   : > { %2715 = shalt.err (!%p2712_p6)
}
  0x50   : > { %2557 = dma.hbm_to_vmem [thread:$0]  (!%p2929_p7), %s3495_s3, 2048, %s215_s7, [#allocation9], %s2842_s16, %s2842_s16, %s2843_s17  }
  0x51   : > { %s63_s12 = sadd.s32 1, %s2826_s20  ;;  %s30_s29 = sadd.s32 1, %s2834_s22 }
  0x52   : > { %p70_p9 = scmp.ne.s32.totalorder %s2826_s20, %s2822_s19  ;;  %p31_p1 = scmp.ge.s32.totalorder %s30_s29, 4 }
  0x53   : > { %p71_p4 = scmp.eq.s32.totalorder %s2838_s23, 0  ;;  %p2565_p5 = scmp.lt.s32.totalorder %s2838_s23, 4 }
  0x54   : > { %s231_s18 = sand.u32 1, %s2838_s23   ;;  %s3520_s29 = smov (%p31_p1, %s30_s29), 0 }
  0x55   : > { %p72_p8 = por %p71_p4, %p70_p9  ;;  %s58_s27 = ssub.s32 %s2834_s22, %s3520_s29 }
  0x56   : > { %s233_s30 = sand.u32 1, %s2826_s20   ;;  %p61_p10 = scmp.eq.s32.totalorder %s58_s27, 0 }
  0x57   : > { %s2294_s8 = sshll.u32 %s233_s30, 3  ;;  %s2295_s9 = sshll.u32 %s2834_s22, 7 }
  0x58   : > { %s3016_s10 = scalar_select %p61_p10, %s2826_s20, %s63_s12  }
  0x59   : > { %s3021_s7 = scalar_lea.hbm %s3493_s1, %s2295_s9  ;;  %s235_s11 = scalar_lea.vmem [#allocation5], %s2294_s8 }
  0x5a   : > { %s243_s13 = sshll.u32 %s235_s11, 4  ;;  %p3027_p7 = pnand %p2565_p5, %p72_p8  ;;  %s3023_s13 = int_to_ptr.vmem [resolvable:$true] %s243_s13 }
  0x5b   : > { %s232_s15 = scalar_lea.sflag [#allocation6], %s231_s18  ;;  %s2716_s6 = scalar_lea.hbm %s3021_s7, 128 }
  0x5c   : > { %p2717_p11 = scmp.ne.s32.totalorder %s3021_s7, %s2716_s6  ;;  %p2718_p12 = pneg %p3027_p7 }
  0x5d   : > { %s2721_s27 = scalar_lea.hbm %s3493_s1, 512  ;;  %p2722_p2 = scmp.lt.u32.totalorder %s3021_s7, %s3493_s1 }
  0x5e   : > { %p2719_p13 = pnand %p2718_p12, %p2717_p11  ;;  %p2723_p3 = scmp.lt.u32.totalorder %s2721_s27, %s2716_s6 }
  0x5f   : > { %p2725_p9 = scmp.lt.u32.totalorder %s2716_s6, %s3021_s7 }
  0x60   : > { %p2720_p0 = pneg %p2719_p13  ;;  %p2724_p6 = por %p2723_p3, %p2722_p2 }
  0x62   : > { %p2726_p1 = por %p2725_p9, %p2724_p6 }
  0x64   : > { %p2727_p4 = pnand %p2726_p1, %p2720_p0 }
  0x66   : > { %2730 = shalt.err (!%p2727_p4)
}
  0x67   : > { %s2731_s18 = scalar_lea.vmem %s3023_s13, 128  ;;  %s2845_s9 = smov [#allocation5]  }
  0x68   : > { %p2732_p5 = scmp.ne.s32.totalorder %s3023_s13, %s2731_s18  ;;  %s2736_s16 = sshll.u32 %s2845_s9, 4  ;;  %s2737_s16 = int_to_ptr.vmem [resolvable:$false] %s2736_s16 }
  0x69   : > { %s2738_s17 = scalar_lea.vmem %s2737_s16, 256  ;;  %p2739_p11 = scmp.lt.s32.totalorder %s3023_s13, %s2737_s16 }
  0x6a   : > { %p2734_p8 = pnand %p2732_p5, %p2718_p12  ;;  %p2740_p13 = scmp.lt.s32.totalorder %s2738_s17, %s2731_s18 }
  0x6c   : > { %p2735_p10 = pneg %p2734_p8  ;;  %p2741_p2 = por %p2740_p13, %p2739_p11 }
  0x6e   : > { %p2742_p3 = pnand %p2741_p2, %p2735_p10 }
  0x70   : > { %2745 = shalt.err (!%p2742_p3)
}
  0x71   : > { %2561 = dma.hbm_to_vmem [thread:$0]  (!%p3027_p7), %s3021_s7, 128, %s3023_s13, %s232_s15  }
  0x72   : > { %p3506_p0 = scmp.ne.s32.totalorder %s3502_s26, 0 }
  0x73   : > { %p3507_p12 = scmp.eq.s32.totalorder (!%p3506_p0), %s2909_s24, 0 }
  0x74   : > { %252 = sbr.rel (%p3506_p0) target bundleno = 994 (0x3e2), region = 40 }
  0x7b   : > { %2797 = dma.done.wait (%p3507_p12), [#allocation3], 512   ;;  %p3508_p6 = pmov %p3507_p12 }
  0x7c   : > { %s258_s11 = sand.u32 1, %s2909_s24   ;;  %s260_s6 = sand.u32 1, %s2822_s19  }
  0x7d   : > { %2799 = vsyncadd (%p3508_p6), [#allocation3], 4294966784  ;;  %s2298_s28 = sshll.u32 %s260_s6, 3  ;;  %s259_s12 = scalar_lea.sflag [#allocation6], %s258_s11 }
  0x7e   : > { %s262_s14 = scalar_lea.vmem [#allocation5], %s2298_s28  ;;  %p3509_p9 = scmp.ne.s32.totalorder %s3501_s25, 0 }
  0x80   : > { %2801 = dma.done.wait (%p3509_p9), %s259_s12, 128  }
  0x81   : > { %2803 = vsyncadd (%p3509_p9), %s259_s12, 4294967168  ;;  %p3510_p7 = pmov %p3508_p6 }
  0x82   : > { %p3511_p1 = pmov %p3508_p6 }
  0x83   : > { %2805 = dma.done.wait (%p3510_p7), [#allocation6], 8192  }
  0x84   : > { %2807 = vsyncadd (%p3511_p1), [#allocation6], 4294959104  ;;  %p3512_p4 = pmov %p3511_p1 }
  0x85   : > { %p3513_p5 = pmov %p3511_p1 }
  0x86   : > { %2809 = dma.done.wait (%p3512_p4), [#allocation9], 2048  }
  0x87   : > { %2811 = vsyncadd (%p3513_p5), [#allocation9], 4294965248  ;;  %v306_v0 = vlaneseq  ;;  %v3078_v2 = vld [vmem:[%s262_s14] sm:$0xff]  ;;  %v2846_v42 = vmov 1966171168   ;;  %s2301_s25 = sshll.u32 %s2830_s21, 7 }
  0x88   : > { %v294_v3 = vunpack.c.0.s8 %v3078_v2  ;;  %v295_v21 = vunpack.c.1.s8 %v3078_v2  ;;  %v296_v33 = vunpack.c.2.s8 %v3078_v2  ;;  %v1048_v43 = vunpack.c.l.s4 %v2846_v42  ;;  %v302_v51 = vld [vmem:[#allocation2] sm:$0xff]  ;;  %v3168_v62 = vld [vmem:[#allocation2 + $0x8] sm:$0xff]  ;;  %s3323_s26 = scalar_lea.vmem [#allocation7], %s2301_s25  ;;  %p2310_p8 = scmp.ne.s32.totalorder %s2830_s21, 0 }
  0x89   : > { %v3076_v1 = vshrl.u32 %v306_v0, 7  ;;  %v1046_v55 = vcombine.high %v302_v51, %v302_v51 }
  0x8a   : > { %v298_v6 = vcvt.s32.f32 %v294_v3  ;;  %v299_v22 = vcvt.s32.f32 %v295_v21  ;;  %v3131_v36 = vcvt.s32.f32 %v296_v33  ;;  %v1049_v46 = vunpack.c.0.s8 %v1048_v43 }
  0x8b   : > { %v3082_v4 = vsub.s32 0, %v3076_v1  ;;  %v3085_v5 = vsub.s32 1, %v3076_v1  ;;  %v3090_v9 = vsub.s32 2, %v3076_v1  ;;  %v3094_v11 = vsub.s32 3, %v3076_v1 }
  0x8c   : > { %v3098_v13 = vsub.s32 4, %v3076_v1  ;;  %v3102_v15 = vsub.s32 5, %v3076_v1  ;;  %v3106_v17 = vsub.s32 6, %v3076_v1  ;;  %v3110_v19 = vsub.s32 7, %v3076_v1 }
  0x8d   : > { %v328_v7 = vrot.slane %v298_v6, %v3085_v5  ;;  %v309_v8 = vrot.slane %v298_v6, %v3082_v4  ;;  %v347_v10 = vrot.slane %v298_v6, %v3090_v9  ;;  %v366_v12 = vrot.slane %v298_v6, %v3094_v11 }
  0x8e   : > { %v385_v14 = vrot.slane %v298_v6, %v3098_v13  ;;  %v404_v16 = vrot.slane %v298_v6, %v3102_v15  ;;  %v423_v18 = vrot.slane %v298_v6, %v3106_v17  ;;  %v442_v20 = vrot.slane %v298_v6, %v3110_v19 }
  0x8f   : > { %330 = vbcast.lane.b32.xlu1 %v328_v7, 256  ;;  %311 = vbcast.lane.b32.xlu0 %v309_v8, 256  ;;  %v461_v23 = vrot.slane %v299_v22, %v3082_v4  ;;  %v480_v24 = vrot.slane %v299_v22, %v3085_v5  ;;  %v499_v25 = vrot.slane %v299_v22, %v3090_v9 }
  0x90   : > { %v518_v26 = vrot.slane %v299_v22, %v3094_v11  ;;  %v537_v27 = vrot.slane %v299_v22, %v3098_v13  ;;  %v556_v28 = vrot.slane %v299_v22, %v3102_v15  ;;  %v575_v29 = vrot.slane %v299_v22, %v3106_v17 }
  0x91   : > { %v594_v32 = vrot.slane %v299_v22, %v3110_v19  ;;  %v613_v39 = vrot.slane %v3131_v36, %v3082_v4  ;;  %v632_v47 = vrot.slane %v3131_v36, %v3085_v5  ;;  %v3154_v50 = vsub.s32 %v1049_v46, %v3076_v1 }
  0x92   : > { %v651_v56 = vrot.slane %v3131_v36, %v3090_v9  ;;  %v3217_v33 = vrot.slane %v3131_v36, %v3102_v15 }
  0x93   : > { %338 = vbcast.lane.b32.xlu1 %v328_v7, 272  ;;  %319 = vbcast.lane.b32.xlu0 %v309_v8, 272  ;;  %v1053_v54 = vrot.slane %v302_v51, %v3154_v50  ;;  %v1060_v60 = vrot.slane %v1046_v55, %v3154_v50 }
  0x95   : > { %v1061_v59 = vcombine.high %v1053_v54, %v1053_v54  ;;  %v1062_v61 = vcombine.high %v1060_v60, %v1060_v60  ;;  %v1069_v63 = vrot.slane %v1053_v54, %v3154_v50 }
  0x97   : > { %323 = vbcast.lane.b32.xlu1 %v309_v8, 280  ;;  %315 = vbcast.lane.b32.xlu0 %v309_v8, 264  ;;  %v1083_v3 = vrot.slane %v1061_v59, %v3154_v50  ;;  %v1091_v6 = vcombine.high %v1069_v63, %v1069_v63  ;;  %v3180_v8 = vrot.slane %v3168_v62, %v3154_v50 }
  0x99   : > { %v1110_v51 = vcombine.high %v3180_v8, %v3180_v8 }
  0x9b   : > { %342 = vbcast.lane.b32.xlu1 %v328_v7, 280  ;;  %334 = vbcast.lane.b32.xlu0 %v328_v7, 264  ;;  %v670_v7 = vrot.slane %v3131_v36, %v3094_v11 }
  0x9f   : > { %357 = vbcast.lane.b32.xlu1 %v347_v10, 272  ;;  %349 = vbcast.lane.b32.xlu0 %v347_v10, 256 }
  0xa3   : > { %361 = vbcast.lane.b32.xlu1 %v347_v10, 280  ;;  %353 = vbcast.lane.b32.xlu0 %v347_v10, 264  ;;  %v1076_v10 = vrot.slane %v1060_v60, %v3154_v50 }
  0xa5   : > { %v1092_v21 = vcombine.high %v1076_v10, %v1076_v10 }
  0xa7   : > { %376 = vbcast.lane.b32.xlu1 %v366_v12, 272  ;;  %368 = vbcast.lane.b32.xlu0 %v366_v12, 256 }
  0xab   : > { %380 = vbcast.lane.b32.xlu1 %v366_v12, 280  ;;  %372 = vbcast.lane.b32.xlu0 %v366_v12, 264  ;;  %v1090_v12 = vrot.slane %v1062_v61, %v3154_v50 }
  0xad   : > { %v1094_v22 = vcombine.high %v1090_v12, %v1090_v12 }
  0xaf   : > { %395 = vbcast.lane.b32.xlu1 %v385_v14, 272  ;;  %387 = vbcast.lane.b32.xlu0 %v385_v14, 256 }
  0xb3   : > { %399 = vbcast.lane.b32.xlu1 %v385_v14, 280  ;;  %391 = vbcast.lane.b32.xlu0 %v385_v14, 264  ;;  %v1093_v14 = vcombine.high %v1083_v3, %v1083_v3 }
  0xb7   : > { %414 = vbcast.lane.b32.xlu1 %v404_v16, 272  ;;  %406 = vbcast.lane.b32.xlu0 %v404_v16, 256 }
  0xbb   : > { %418 = vbcast.lane.b32.xlu1 %v404_v16, 280  ;;  %410 = vbcast.lane.b32.xlu0 %v404_v16, 264 }
  0xbf   : > { %433 = vbcast.lane.b32.xlu1 %v423_v18, 272  ;;  %425 = vbcast.lane.b32.xlu0 %v423_v18, 256 }
  0xc3   : > { %437 = vbcast.lane.b32.xlu1 %v423_v18, 280  ;;  %429 = vbcast.lane.b32.xlu0 %v423_v18, 264 }
  0xc7   : > { %452 = vbcast.lane.b32.xlu1 %v442_v20, 272  ;;  %444 = vbcast.lane.b32.xlu0 %v442_v20, 256 }
  0xcb   : > { %456 = vbcast.lane.b32.xlu1 %v442_v20, 280  ;;  %448 = vbcast.lane.b32.xlu0 %v442_v20, 264  ;;  %v1501_v20 = vrot.slane %v1069_v63, %v3082_v4 }
  0xcf   : > { %471 = vbcast.lane.b32.xlu1 %v461_v23, 272  ;;  %463 = vbcast.lane.b32.xlu0 %v461_v23, 256 }
  0xd3   : > { %475 = vbcast.lane.b32.xlu1 %v461_v23, 280  ;;  %467 = vbcast.lane.b32.xlu0 %v461_v23, 264  ;;  %v1505_v23 = vrot.slane %v1083_v3, %v3082_v4 }
  0xd7   : > { %490 = vbcast.lane.b32.xlu1 %v480_v24, 272  ;;  %482 = vbcast.lane.b32.xlu0 %v480_v24, 256 }
  0xdb   : > { %494 = vbcast.lane.b32.xlu1 %v480_v24, 280  ;;  %486 = vbcast.lane.b32.xlu0 %v480_v24, 264  ;;  %v1509_v24 = vrot.slane %v1091_v6, %v3082_v4 }
  0xdf   : > { %509 = vbcast.lane.b32.xlu1 %v499_v25, 272  ;;  %501 = vbcast.lane.b32.xlu0 %v499_v25, 256 }
  0xe3   : > { %513 = vbcast.lane.b32.xlu1 %v499_v25, 280  ;;  %505 = vbcast.lane.b32.xlu0 %v499_v25, 264  ;;  %v3193_v25 = vrot.slane %v3180_v8, %v3154_v50 }
  0xe7   : > { %528 = vbcast.lane.b32.xlu1 %v518_v26, 272  ;;  %520 = vbcast.lane.b32.xlu0 %v518_v26, 256 }
  0xeb   : > { %532 = vbcast.lane.b32.xlu1 %v518_v26, 280  ;;  %524 = vbcast.lane.b32.xlu0 %v518_v26, 264  ;;  %v1513_v26 = vrot.slane %v1093_v14, %v3082_v4 }
  0xef   : > { %547 = vbcast.lane.b32.xlu1 %v537_v27, 272  ;;  %539 = vbcast.lane.b32.xlu0 %v537_v27, 256 }
  0xf3   : > { %551 = vbcast.lane.b32.xlu1 %v537_v27, 280  ;;  %543 = vbcast.lane.b32.xlu0 %v537_v27, 264  ;;  %v3201_v27 = vrot.slane %v1076_v10, %v3082_v4 }
  0xf7   : > { %566 = vbcast.lane.b32.xlu1 %v556_v28, 272  ;;  %558 = vbcast.lane.b32.xlu0 %v556_v28, 256 }
  0xfb   : > { %570 = vbcast.lane.b32.xlu1 %v556_v28, 280  ;;  %562 = vbcast.lane.b32.xlu0 %v556_v28, 264  ;;  %v3204_v28 = vrot.slane %v1090_v12, %v3082_v4 }
  0xff   : > { %585 = vbcast.lane.b32.xlu1 %v575_v29, 272  ;;  %577 = vbcast.lane.b32.xlu0 %v575_v29, 256 }
 0x101   : > { %v3121_v30 = vpop.permute.xlu1 %330  ;;  %v3123_v31 = vpop.permute.xlu0 %311 }
 0x102   : > { %vm918_vm0 = vcmp.gt.f32.partialorder %v3121_v30, 0.5  ;;  %vm914_vm1 = vcmp.gt.f32.partialorder %v3123_v31, 0.5  ;;  %v689_v30 = vrot.slane %v3131_v36, %v3098_v13  ;;  %v3213_v31 = vrot.slane %v1092_v21, %v3082_v4 }
 0x103   : > { %589 = vbcast.lane.b32.xlu1 %v575_v29, 280  ;;  %581 = vbcast.lane.b32.xlu0 %v575_v29, 264  ;;  %v1658_v42 = vsel %vm914_vm1, %v1501_v20, -inf }
 0x105   : > { %v3127_v34 = vpop.permute.xlu1 %338  ;;  %v3129_v35 = vpop.permute.xlu0 %319 }
 0x106   : > { %vm920_vm2 = vcmp.gt.f32.partialorder %v3127_v34, 0.5  ;;  %vm916_vm3 = vcmp.gt.f32.partialorder %v3129_v35, 0.5  ;;  %v3220_v34 = vrot.slane %v1094_v22, %v3082_v4  ;;  %v3224_v35 = vrot.slane %v3131_v36, %v3106_v17 }
 0x107   : > { %604 = vbcast.lane.b32.xlu1 %v594_v32, 272  ;;  %596 = vbcast.lane.b32.xlu0 %v594_v32, 256  ;;  %v1664_v43 = vsel %vm920_vm2, %v1505_v23, -inf  ;;  %v1660_v46 = vsel %vm916_vm3, %v1501_v20, -inf }
 0x109   : > { %v3133_v37 = vpop.permute.xlu1 %323  ;;  %v3135_v38 = vpop.permute.xlu0 %315 }
 0x10a   : > { %vm917_vm6 = vcmp.gt.f32.partialorder %v3133_v37, 0.5  ;;  %vm915_vm7 = vcmp.gt.f32.partialorder %v3135_v38, 0.5 }
 0x10b   : > { %608 = vbcast.lane.b32.xlu1 %v594_v32, 280  ;;  %600 = vbcast.lane.b32.xlu0 %v594_v32, 264  ;;  %v1661_v60 = vsel %vm917_vm6, %v1501_v20, -inf  ;;  %v1659_v61 = vsel %vm915_vm7, %v1501_v20, -inf }
 0x10d   : > { %v3139_v40 = vpop.permute.xlu1 %342  ;;  %v3141_v41 = vpop.permute.xlu0 %334 }
 0x10e   : > { %vm921_vm4 = vcmp.gt.f32.partialorder %v3139_v40, 0.5  ;;  %vm919_vm5 = vcmp.gt.f32.partialorder %v3141_v41, 0.5 }
 0x10f   : > { %623 = vbcast.lane.b32.xlu1 %v613_v39, 272  ;;  %615 = vbcast.lane.b32.xlu0 %v613_v39, 256  ;;  %v1665_v41 = vsel %vm921_vm4, %v1505_v23, -inf  ;;  %v1663_v59 = vsel %vm919_vm5, %v1505_v23, -inf }
 0x110   : > { %v1879_v10 = vmax.f32 %v1661_v60, %v1665_v41  ;;  %v1817_v37 = vmax.f32 %v1659_v61, %v1663_v59 }
 0x111   : > { %v3143_v44 = vpop.permute.xlu1 %357  ;;  %v3145_v45 = vpop.permute.xlu0 %349 }
 0x112   : > { %vm924_vm8 = vcmp.gt.f32.partialorder %v3143_v44, 0.5  ;;  %vm922_vm9 = vcmp.gt.f32.partialorder %v3145_v45, 0.5 }
 0x113   : > { %627 = vbcast.lane.b32.xlu1 %v613_v39, 280  ;;  %619 = vbcast.lane.b32.xlu0 %v613_v39, 264  ;;  %v1662_v39 = vsel %vm918_vm0, %v1505_v23, -inf  ;;  %v1668_v63 = vsel %vm924_vm8, %v1509_v24, -inf }
 0x114   : > { %v1786_v40 = vmax.f32 %v1658_v42, %v1662_v39 }
 0x115   : > { %v3149_v48 = vpop.permute.xlu1 %361  ;;  %v3151_v49 = vpop.permute.xlu0 %353 }
 0x116   : > { %vm925_vm10 = vcmp.gt.f32.partialorder %v3149_v48, 0.5  ;;  %vm923_vm11 = vcmp.gt.f32.partialorder %v3151_v49, 0.5  ;;  %v1666_v48 = vsel %vm922_vm9, %v1509_v24, -inf }
 0x117   : > { %642 = vbcast.lane.b32.xlu1 %v632_v47, 272  ;;  %634 = vbcast.lane.b32.xlu0 %v632_v47, 256  ;;  %v1669_v49 = vsel %vm925_vm10, %v1509_v24, -inf  ;;  %v1667_v3 = vsel %vm923_vm11, %v1509_v24, -inf  ;;  %v1787_v14 = vmax.f32 %v1786_v40, %v1666_v48 }
 0x118   : > { %v1880_v45 = vmax.f32 %v1879_v10, %v1669_v49  ;;  %v1818_v20 = vmax.f32 %v1817_v37, %v1667_v3 }
 0x119   : > { %v3156_v52 = vpop.permute.xlu1 %376  ;;  %v3158_v53 = vpop.permute.xlu0 %368 }
 0x11a   : > { %vm928_vm12 = vcmp.gt.f32.partialorder %v3156_v52, 0.5  ;;  %vm926_vm13 = vcmp.gt.f32.partialorder %v3158_v53, 0.5 }
 0x11b   : > { %646 = vbcast.lane.b32.xlu1 %v632_v47, 280  ;;  %638 = vbcast.lane.b32.xlu0 %v632_v47, 264  ;;  %v3230_v47 = vrot.slane %v3193_v25, %v3082_v4  ;;  %v1672_v38 = vsel %vm928_vm12, %v1513_v26, -inf  ;;  %v1670_v44 = vsel %vm926_vm13, %v1513_v26, -inf }
 0x11c   : > { %v1788_v23 = vmax.f32 %v1787_v14, %v1670_v44 }
 0x11d   : > { %v3163_v57 = vpop.permute.xlu1 %380  ;;  %v3165_v58 = vpop.permute.xlu0 %372 }
 0x11e   : > { %vm929_vm14 = vcmp.gt.f32.partialorder %v3163_v57, 0.5  ;;  %vm927_vm15 = vcmp.gt.f32.partialorder %v3165_v58, 0.5 }
 0x11f   : > { %661 = vbcast.lane.b32.xlu1 %v651_v56, 272  ;;  %653 = vbcast.lane.b32.xlu0 %v651_v56, 256  ;;  %v1673_v21 = vsel %vm929_vm14, %v1513_v26, -inf  ;;  %v1671_v52 = vsel %vm927_vm15, %v1513_v26, -inf }
 0x120   : > { %v1819_v57 = vmax.f32 %v1818_v20, %v1671_v52 }
 0x121   : > { %v3171_v0 = vpop.permute.xlu1 %395  ;;  %v3173_v1 = vpop.permute.xlu0 %387 }
 0x122   : > { %vm932_vm2 = vcmp.gt.f32.partialorder %v3171_v0, 0.5  ;;  %vm930_vm3 = vcmp.gt.f32.partialorder %v3173_v1, 0.5 }
 0x123   : > { %665 = vbcast.lane.b32.xlu1 %v651_v56, 280  ;;  %657 = vbcast.lane.b32.xlu0 %v651_v56, 264  ;;  %v1848_v56 = vmax.f32 %v1660_v46, %v1664_v43  ;;  %v1676_v58 = vsel %vm932_vm2, %v3201_v27, -inf  ;;  %v1674_v0 = vsel %vm930_vm3, %v3201_v27, -inf }
 0x125   : > { %v3184_v16 = vpop.permute.xlu1 %399  ;;  %v3186_v18 = vpop.permute.xlu0 %391  ;;  %v1849_v12 = vmax.f32 %v1848_v56, %v1668_v63 }
 0x126   : > { %vm933_vm0 = vcmp.gt.f32.partialorder %v3184_v16, 0.5  ;;  %vm931_vm1 = vcmp.gt.f32.partialorder %v3186_v18, 0.5 }
 0x127   : > { %680 = vbcast.lane.b32.xlu1 %v670_v7, 272  ;;  %672 = vbcast.lane.b32.xlu0 %v670_v7, 256  ;;  %v1850_v22 = vmax.f32 %v1849_v12, %v1672_v38  ;;  %v1677_v18 = vsel %vm933_vm0, %v3201_v27, -inf  ;;  %v1675_v24 = vsel %vm931_vm1, %v3201_v27, -inf }
 0x128   : > { %v1820_v26 = vmax.f32 %v1819_v57, %v1675_v24 }
 0x129   : > { %v3206_v29 = vpop.permute.xlu1 %414  ;;  %v3208_v32 = vpop.permute.xlu0 %406 }
 0x12a   : > { %vm936_vm6 = vcmp.gt.f32.partialorder %v3206_v29, 0.5  ;;  %vm934_vm7 = vcmp.gt.f32.partialorder %v3208_v32, 0.5 }
 0x12b   : > { %684 = vbcast.lane.b32.xlu1 %v670_v7, 280  ;;  %676 = vbcast.lane.b32.xlu0 %v670_v7, 264  ;;  %v1680_v32 = vsel %vm936_vm6, %v3204_v28, -inf  ;;  %v1678_v46 = vsel %vm934_vm7, %v3204_v28, -inf }
 0x12d   : > { %v419_v54 = vpop.permute.xlu1 %418  ;;  %v411_v55 = vpop.permute.xlu0 %410 }
 0x12e   : > { %vm937_vm4 = vcmp.gt.f32.partialorder %v419_v54, 0.5  ;;  %vm935_vm5 = vcmp.gt.f32.partialorder %v411_v55, 0.5  ;;  %v1851_v54 = vmax.f32 %v1850_v22, %v1676_v58  ;;  %v1789_v55 = vmax.f32 %v1788_v23, %v1674_v0 }
 0x12f   : > { %699 = vbcast.lane.b32.xlu1 %v689_v30, 272  ;;  %691 = vbcast.lane.b32.xlu0 %v689_v30, 256  ;;  %v1681_v39 = vsel %vm937_vm4, %v3204_v28, -inf  ;;  %v1679_v42 = vsel %vm935_vm5, %v3204_v28, -inf  ;;  %v1132_v22 = vrot.slane %v1110_v51, %v3154_v50  ;;  %v297_v23 = vunpack.c.3.s8 %v3078_v2 }
 0x130   : > { %v1821_v41 = vmax.f32 %v1820_v26, %v1679_v42  ;;  %v1852_v59 = vmax.f32 %v1851_v54, %v1680_v32  ;;  %v1790_v60 = vmax.f32 %v1789_v55, %v1678_v46 }
 0x131   : > { %v434_v6 = vpop.permute.xlu1 %433  ;;  %v426_v7 = vpop.permute.xlu0 %425  ;;  %v3302_v57 = vcvt.s32.f32 %v297_v23 }
 0x132   : > { %vm940_vm10 = vcmp.gt.f32.partialorder %v434_v6, 0.5  ;;  %vm938_vm11 = vcmp.gt.f32.partialorder %v426_v7, 0.5 }
 0x133   : > { %703 = vbcast.lane.b32.xlu1 %v689_v30, 280  ;;  %695 = vbcast.lane.b32.xlu0 %v689_v30, 264  ;;  %v1881_v30 = vmax.f32 %v1880_v45, %v1673_v21  ;;  %v1684_v28 = vsel %vm940_vm10, %v3213_v31, -inf  ;;  %v1682_v61 = vsel %vm938_vm11, %v3213_v31, -inf  ;;  %v746_v45 = vrot.slane %v3131_v36, %v3110_v19 }
 0x134   : > { %v1853_v37 = vmax.f32 %v1852_v59, %v1684_v28  ;;  %v765_v26 = vrot.slane %v3302_v57, %v3082_v4  ;;  %v1095_v28 = vcombine.high %v3168_v62, %v3168_v62 }
 0x135   : > { %v438_v53 = vpop.permute.xlu1 %437  ;;  %v430_v16 = vpop.permute.xlu0 %429  ;;  %v1882_v1 = vmax.f32 %v1881_v30, %v1677_v18 }
 0x136   : > { %vm941_vm8 = vcmp.gt.f32.partialorder %v438_v53, 0.5  ;;  %vm939_vm9 = vcmp.gt.f32.partialorder %v430_v16, 0.5 }
 0x137   : > { %718 = vbcast.lane.b32.xlu1 %v3217_v33, 272  ;;  %710 = vbcast.lane.b32.xlu0 %v3217_v33, 256  ;;  %v1685_v27 = vsel %vm941_vm8, %v3213_v31, -inf  ;;  %v1683_v40 = vsel %vm939_vm9, %v3213_v31, -inf  ;;  %v1883_v56 = vmax.f32 %v1882_v1, %v1681_v39  ;;  %v1791_v31 = vmax.f32 %v1790_v60, %v1682_v61 }
 0x138   : > { %v1822_v3 = vmax.f32 %v1821_v41, %v1683_v40  ;;  %v1142_v60 = vcombine.high %v1132_v22, %v1132_v22 }
 0x139   : > { %v453_v43 = vpop.permute.xlu1 %452  ;;  %v445_v29 = vpop.permute.xlu0 %444  ;;  %v1884_v49 = vmax.f32 %v1883_v56, %v1685_v27 }
 0x13a   : > { %vm944_vm12 = vcmp.gt.f32.partialorder %v453_v43, 0.5  ;;  %vm942_vm13 = vcmp.gt.f32.partialorder %v445_v29, 0.5 }
 0x13b   : > { %722 = vbcast.lane.b32.xlu1 %v3217_v33, 280  ;;  %714 = vbcast.lane.b32.xlu0 %v3217_v33, 264  ;;  %v1688_v6 = vsel %vm944_vm12, %v3220_v34, -inf  ;;  %v1686_v33 = vsel %vm942_vm13, %v3220_v34, -inf }
 0x13c   : > { %v1854_v20 = vmax.f32 %v1853_v37, %v1688_v6  ;;  %v1792_v21 = vmax.f32 %v1791_v31, %v1686_v33  ;;  %v1109_v33 = vrot.slane %v1095_v28, %v3154_v50 }
 0x13d   : > { %v457_v63 = vpop.permute.xlu1 %456  ;;  %v449_v48 = vpop.permute.xlu0 %448 }
 0x13e   : > { %vm945_vm14 = vcmp.gt.f32.partialorder %v457_v63, 0.5  ;;  %vm943_vm15 = vcmp.gt.f32.partialorder %v449_v48, 0.5  ;;  %v1111_v23 = vcombine.high %v1109_v33, %v1109_v33 }
 0x13f   : > { %v1689_v7 = vsel %vm945_vm14, %v3220_v34, -inf  ;;  %v1687_v10 = vsel %vm943_vm15, %v3220_v34, -inf  ;;  %737 = vbcast.lane.b32.xlu1 %v3224_v35, 272  ;;  %729 = vbcast.lane.b32.xlu0 %v3224_v35, 256 }
 0x140   : > { %v1885_v38 = vmax.f32 %v1884_v49, %v1689_v7  ;;  %v1823_v44 = vmax.f32 %v1822_v3, %v1687_v10 }
 0x141   : > { %v472_v12 = vpop.permute.xlu1 %471  ;;  %v464_v14 = vpop.permute.xlu0 %463 }
 0x142   : > { %vm948_vm0 = vcmp.gt.f32.partialorder %v472_v12, 0.5  ;;  %vm946_vm1 = vcmp.gt.f32.partialorder %v464_v14, 0.5  ;;  %v3318_v12 = vrot.slane %v1109_v33, %v3154_v50 }
 0x143   : > { %v1692_v52 = vsel %vm948_vm0, %v3230_v47, -inf  ;;  %v1690_v34 = vsel %vm946_vm1, %v3230_v47, -inf  ;;  %741 = vbcast.lane.b32.xlu1 %v3224_v35, 280  ;;  %733 = vbcast.lane.b32.xlu0 %v3224_v35, 264  ;;  %v1537_v35 = vrot.slane %v1132_v22, %v3082_v4 }
 0x144   : > { %v1855_v36 = vmax.f32 %v1854_v20, %v1692_v52  ;;  %v1793_v53 = vmax.f32 %v1792_v21, %v1690_v34  ;;  %v1549_v22 = vrot.slane %v3318_v12, %v3082_v4 }
 0x145   : > { %v476_v16 = vpop.permute.xlu1 %475  ;;  %v468_v18 = vpop.permute.xlu0 %467 }
 0x146   : > { %vm949_vm2 = vcmp.gt.f32.partialorder %v476_v16, 0.5  ;;  %vm947_vm3 = vcmp.gt.f32.partialorder %v468_v18, 0.5  ;;  %v1920_v18 = vld [vmem:[%s3323_s26] sm:$0xff] }
 0x147   : > { %v1693_v24 = vsel %vm949_vm2, %v3230_v47, -inf  ;;  %v1691_v30 = vsel %vm947_vm3, %v3230_v47, -inf  ;;  %756 = vbcast.lane.b32.xlu1 %v746_v45, 272  ;;  %748 = vbcast.lane.b32.xlu0 %v746_v45, 256  ;;  %v1140_v47 = vcombine.high %v3193_v25, %v3193_v25  ;;  %v784_v25 = vrot.slane %v3302_v57, %v3085_v5 }
 0x148   : > { %v1886_v8 = vmax.f32 %v1885_v38, %v1693_v24  ;;  %v1824_v51 = vmax.f32 %v1823_v44, %v1691_v30  ;;  %v1545_v5 = vrot.slane %v1142_v60, %v3082_v4  ;;  %v803_v44 = vrot.slane %v3302_v57, %v3090_v9  ;;  %v1921_v24 = vld [vmem:[%s3323_s26 + $0x8] sm:$0xff] }
 0x149   : > { %v491_v58 = vpop.permute.xlu1 %490  ;;  %v483_v2 = vpop.permute.xlu0 %482  ;;  %v1541_v54 = vrot.slane %v1140_v47, %v3082_v4  ;;  %v2434_v30 = vpack.c.bf16 %v1921_v24, %v1920_v18  ;;  %v1922_v47 = vld [vmem:[%s3323_s26 + $0x10] sm:$0xff]  ;;  %v1141_v60 = vcombine.high %v3318_v12, %v3318_v12 }
 0x14a   : > { %vm952_vm4 = vcmp.gt.f32.partialorder %v491_v58, 0.5  ;;  %vm950_vm5 = vcmp.gt.f32.partialorder %v483_v2, 0.5  ;;  %v3330_v58 = vrot.slane %v1111_v23, %v3154_v50 }
 0x14b   : > { %v1696_v0 = vsel %vm952_vm4, %v1537_v35, -inf  ;;  %v1694_v1 = vsel %vm950_vm5, %v1537_v35, -inf  ;;  %760 = vbcast.lane.b32.xlu1 %v746_v45, 280  ;;  %752 = vbcast.lane.b32.xlu0 %v746_v45, 264  ;;  %v1557_v33 = vrot.slane %v1141_v60, %v3082_v4 }
 0x14c   : > { %v1856_v39 = vmax.f32 %v1855_v36, %v1696_v0  ;;  %v1794_v42 = vmax.f32 %v1793_v53, %v1694_v1  ;;  %2435 = vmatprep.subr.bf16.mxu0 %v2434_v30  ;;  %2498 = vmatprep.subr.bf16.mxu1 %v2434_v30 }
 0x14d   : > { %v495_v43 = vpop.permute.xlu1 %494  ;;  %v487_v29 = vpop.permute.xlu0 %486  ;;  %2437 = vmatpush3.bf16.msra.mxu0 %v2434_v30  ;;  %2506 = vmatpush3.bf16.msra.mxu1 %v2434_v30 }
 0x14e   : > { %vm953_vm6 = vcmp.gt.f32.partialorder %v495_v43, 0.5  ;;  %vm951_vm7 = vcmp.gt.f32.partialorder %v487_v29, 0.5  ;;  %v1553_v29 = vrot.slane %v3330_v58, %v3082_v4 }
 0x14f   : > { %v1697_v32 = vsel %vm953_vm6, %v1537_v35, -inf  ;;  %v1695_v46 = vsel %vm951_vm7, %v1537_v35, -inf  ;;  %775 = vbcast.lane.b32.xlu1 %v765_v26, 272  ;;  %767 = vbcast.lane.b32.xlu0 %v765_v26, 256 }
 0x150   : > { %v1887_v55 = vmax.f32 %v1886_v8, %v1697_v32  ;;  %v1825_v27 = vmax.f32 %v1824_v51, %v1695_v46  ;;  %v822_v51 = vrot.slane %v3302_v57, %v3094_v11 }
 0x151   : > { %v510_v40 = vpop.permute.xlu1 %509  ;;  %v502_v56 = vpop.permute.xlu0 %501 }
 0x152   : > { %vm956_vm8 = vcmp.gt.f32.partialorder %v510_v40, 0.5  ;;  %vm954_vm9 = vcmp.gt.f32.partialorder %v502_v56, 0.5  ;;  %v1925_v40 = vld [vmem:[%s3323_s26 + $0x28] sm:$0xff] }
 0x153   : > { %v1700_v41 = vsel %vm956_vm8, %v1541_v54, -inf  ;;  %v1698_v59 = vsel %vm954_vm9, %v1541_v54, -inf  ;;  %779 = vbcast.lane.b32.xlu1 %v765_v26, 280  ;;  %771 = vbcast.lane.b32.xlu0 %v765_v26, 264 }
 0x154   : > { %v1857_v61 = vmax.f32 %v1856_v39, %v1700_v41  ;;  %v1795_v63 = vmax.f32 %v1794_v42, %v1698_v59  ;;  %v1923_v39 = vld [vmem:[%s3323_s26 + $0x18] sm:$0xff]  ;;  %v841_v59 = vrot.slane %v3302_v57, %v3098_v13 }
 0x155   : > { %v514_v48 = vpop.permute.xlu1 %513  ;;  %v506_v49 = vpop.permute.xlu0 %505  ;;  %v2438_v11 = vpack.c.bf16 %v1923_v39, %v1922_v47  ;;  %v879_v47 = vrot.slane %v3302_v57, %v3106_v17 }
 0x156   : > { %vm957_vm10 = vcmp.gt.f32.partialorder %v514_v48, 0.5  ;;  %vm955_vm11 = vcmp.gt.f32.partialorder %v506_v49, 0.5  ;;  %v1926_v49 = vld [vmem:[%s3323_s26 + $0x30] sm:$0xff] }
 0x157   : > { %v1701_v3 = vsel %vm957_vm10, %v1541_v54, -inf  ;;  %v1699_v6 = vsel %vm955_vm11, %v1541_v54, -inf  ;;  %794 = vbcast.lane.b32.xlu1 %v784_v25, 272  ;;  %786 = vbcast.lane.b32.xlu0 %v784_v25, 256 }
 0x158   : > { %v1888_v7 = vmax.f32 %v1887_v55, %v1701_v3  ;;  %v1826_v10 = vmax.f32 %v1825_v27, %v1699_v6  ;;  %2439 = vmatprep.subr.bf16.mxu0 %v2438_v11  ;;  %2499 = vmatprep.subr.bf16.mxu1 %v2438_v11  ;;  %v1924_v27 = vld [vmem:[%s3323_s26 + $0x20] sm:$0xff]  ;;  %v1927_v3 = vld [vmem:[%s3323_s26 + $0x38] sm:$0xff] }
 0x159   : > { %v529_v37 = vpop.permute.xlu1 %528  ;;  %v521_v31 = vpop.permute.xlu0 %520  ;;  %2441 = vmatpush3.bf16.msra.mxu0 %v2438_v11  ;;  %2507 = vmatpush3.bf16.msra.mxu1 %v2438_v11  ;;  %v2442_v56 = vpack.c.bf16 %v1925_v40, %v1924_v27  ;;  %v2446_v13 = vpack.c.bf16 %v1927_v3, %v1926_v49 }
 0x15a   : > { %vm960_vm12 = vcmp.gt.f32.partialorder %v529_v37, 0.5  ;;  %vm958_vm13 = vcmp.gt.f32.partialorder %v521_v31, 0.5 }
 0x15b   : > { %v1704_v62 = vsel %vm960_vm12, %v1545_v5, -inf  ;;  %v1702_v38 = vsel %vm958_vm13, %v1545_v5, -inf  ;;  %798 = vbcast.lane.b32.xlu1 %v784_v25, 280  ;;  %790 = vbcast.lane.b32.xlu0 %v784_v25, 264 }
 0x15c   : > { %v1858_v14 = vmax.f32 %v1857_v61, %v1704_v62  ;;  %v1796_v45 = vmax.f32 %v1795_v63, %v1702_v38  ;;  %2443 = vmatprep.subr.bf16.mxu0 %v2442_v56  ;;  %2500 = vmatprep.subr.bf16.mxu1 %v2442_v56  ;;  %v1928_v62 = vld [vmem:[%s3323_s26 + $0x40] sm:$0xff]  ;;  %v1929_v38 = vld [vmem:[%s3323_s26 + $0x48] sm:$0xff] }
 0x15d   : > { %v533_v20 = vpop.permute.xlu1 %532  ;;  %v525_v21 = vpop.permute.xlu0 %524  ;;  %2445 = vmatpush3.bf16.msra.mxu0 %v2442_v56  ;;  %2508 = vmatpush3.bf16.msra.mxu1 %v2442_v56 }
 0x15e   : > { %vm961_vm14 = vcmp.gt.f32.partialorder %v533_v20, 0.5  ;;  %vm959_vm15 = vcmp.gt.f32.partialorder %v525_v21, 0.5  ;;  %2447 = vmatprep.subr.bf16.mxu0 %v2446_v13  ;;  %2501 = vmatprep.subr.bf16.mxu1 %v2446_v13  ;;  %v1143_v20 = vcombine.high %v3330_v58, %v3330_v58  ;;  %v1932_v58 = vld [vmem:[%s3323_s26 + $0x60] sm:$0xff] }
 0x15f   : > { %v1705_v52 = vsel %vm961_vm14, %v1545_v5, -inf  ;;  %v1703_v34 = vsel %vm959_vm15, %v1545_v5, -inf  ;;  %813 = vbcast.lane.b32.xlu1 %v803_v44, 272  ;;  %805 = vbcast.lane.b32.xlu0 %v803_v44, 256 }
 0x160   : > { %v1889_v36 = vmax.f32 %v1888_v7, %v1705_v52  ;;  %v1827_v9 = vmax.f32 %v1826_v10, %v1703_v34  ;;  %v3367_v34 = vld [vmem:[#allocation2 + $0x10] sm:$0xff]  ;;  %v1561_v18 = vrot.slane %v1143_v20, %v3082_v4 }
 0x161   : > { %v548_v53 = vpop.permute.xlu1 %547  ;;  %v540_v16 = vpop.permute.xlu0 %539  ;;  %2449 = vmatpush3.bf16.msra.mxu0 %v2446_v13  ;;  %2509 = vmatpush3.bf16.msra.mxu1 %v2446_v13  ;;  %v1151_v24 = vrot.slane %v3367_v34, %v3154_v50 }
 0x162   : > { %vm964_vm0 = vcmp.gt.f32.partialorder %v548_v53, 0.5  ;;  %vm962_vm1 = vcmp.gt.f32.partialorder %v540_v16, 0.5 }
 0x163   : > { %v1708_v35 = vsel %vm964_vm0, %v1549_v22, -inf  ;;  %v1706_v8 = vsel %vm962_vm1, %v1549_v22, -inf  ;;  %817 = vbcast.lane.b32.xlu1 %v803_v44, 280  ;;  %809 = vbcast.lane.b32.xlu0 %v803_v44, 264  ;;  %v2450_v44 = vpack.c.bf16 %v1929_v38, %v1928_v62  ;;  %v3383_v39 = vrot.slane %v1151_v24, %v3154_v50 }
 0x164   : > { %v3332_v2 = vmax.f32 %v1858_v14, %v1708_v35  ;;  %v3334_v0 = vmax.f32 %v1796_v45, %v1706_v8  ;;  %v860_v45 = vrot.slane %v3302_v57, %v3102_v15  ;;  %v1159_v40 = vcombine.high %v1151_v24, %v1151_v24 }
 0x165   : > { %v552_v1 = vpop.permute.xlu1 %551  ;;  %v544_v26 = vpop.permute.xlu0 %543  ;;  %2451 = vmatprep.subr.bf16.mxu0 %v2450_v44  ;;  %2502 = vmatprep.subr.bf16.mxu1 %v2450_v44  ;;  %v1565_v27 = vrot.slane %v3383_v39, %v3082_v4  ;;  %v1189_v62 = vcombine.high %v3383_v39, %v3383_v39 }
 0x166   : > { %vm965_vm2 = vcmp.gt.f32.partialorder %v552_v1, 0.5  ;;  %vm963_vm3 = vcmp.gt.f32.partialorder %v544_v26, 0.5  ;;  %2453 = vmatpush3.bf16.msra.mxu0 %v2450_v44  ;;  %2510 = vmatpush3.bf16.msra.mxu1 %v2450_v44 }
 0x167   : > { %v1709_v42 = vsel %vm965_vm2, %v1549_v22, -inf  ;;  %v1707_v43 = vsel %vm963_vm3, %v1549_v22, -inf  ;;  %832 = vbcast.lane.b32.xlu1 %v822_v51, 272  ;;  %824 = vbcast.lane.b32.xlu0 %v822_v51, 256 }
 0x168   : > { %v3340_v32 = vmax.f32 %v1889_v36, %v1709_v42  ;;  %v3342_v46 = vmax.f32 %v1827_v9, %v1707_v43  ;;  %v1930_v36 = vld [vmem:[%s3323_s26 + $0x50] sm:$0xff]  ;;  %v1931_v9 = vld [vmem:[%s3323_s26 + $0x58] sm:$0xff] }
 0x169   : > { %v567_v54 = vpop.permute.xlu1 %566  ;;  %v559_v55 = vpop.permute.xlu0 %558  ;;  %v2454_v15 = vpack.c.bf16 %v1931_v9, %v1930_v36 }
 0x16a   : > { %vm968_vm4 = vcmp.gt.f32.partialorder %v567_v54, 0.5  ;;  %vm966_vm5 = vcmp.gt.f32.partialorder %v559_v55, 0.5 }
 0x16b   : > { %v1712_v25 = vsel %vm968_vm4, %v1553_v29, -inf  ;;  %v1710_v41 = vsel %vm966_vm5, %v1553_v29, -inf  ;;  %836 = vbcast.lane.b32.xlu1 %v822_v51, 280  ;;  %828 = vbcast.lane.b32.xlu0 %v822_v51, 264 }
 0x16c   : > { %v1860_v28 = vmax.f32 %v3332_v2, %v1712_v25  ;;  %v1798_v61 = vmax.f32 %v3334_v0, %v1710_v41  ;;  %2455 = vmatprep.subr.bf16.mxu0 %v2454_v15  ;;  %2503 = vmatprep.subr.bf16.mxu1 %v2454_v15  ;;  %v1933_v2 = vld [vmem:[%s3323_s26 + $0x68] sm:$0xff] }
 0x16d   : > { %v571_v63 = vpop.permute.xlu1 %570  ;;  %v563_v48 = vpop.permute.xlu0 %562  ;;  %2457 = vmatpush3.bf16.msra.mxu0 %v2454_v15  ;;  %2511 = vmatpush3.bf16.msra.mxu1 %v2454_v15  ;;  %v2458_v0 = vpack.c.bf16 %v1933_v2, %v1932_v58 }
 0x16e   : > { %vm969_vm6 = vcmp.gt.f32.partialorder %v571_v63, 0.5  ;;  %vm967_vm7 = vcmp.gt.f32.partialorder %v563_v48, 0.5  ;;  %v1181_v63 = vrot.slane %v1159_v40, %v3154_v50 }
 0x16f   : > { %v1713_v6 = vsel %vm969_vm6, %v1553_v29, -inf  ;;  %v1711_v5 = vsel %vm967_vm7, %v1553_v29, -inf  ;;  %851 = vbcast.lane.b32.xlu1 %v841_v59, 272  ;;  %843 = vbcast.lane.b32.xlu0 %v841_v59, 256 }
 0x170   : > { %v1891_v7 = vmax.f32 %v3340_v32, %v1713_v6  ;;  %v1829_v10 = vmax.f32 %v3342_v46, %v1711_v5  ;;  %2459 = vmatprep.subr.bf16.mxu0 %v2458_v0  ;;  %2504 = vmatprep.subr.bf16.mxu1 %v2458_v0  ;;  %v1934_v32 = vld [vmem:[%s3323_s26 + $0x70] sm:$0xff]  ;;  %v1935_v46 = vld [vmem:[%s3323_s26 + $0x78] sm:$0xff] }
 0x171   : > { %v586_v37 = vpop.permute.xlu1 %585  ;;  %v578_v31 = vpop.permute.xlu0 %577  ;;  %2461 = vmatpush3.bf16.msra.mxu0 %v2458_v0  ;;  %2512 = vmatpush3.bf16.msra.mxu1 %v2458_v0  ;;  %v2462_v54 = vpack.c.bf16 %v1935_v46, %v1934_v32 }
 0x172   : > { %vm972_vm8 = vcmp.gt.f32.partialorder %v586_v37, 0.5  ;;  %vm970_vm9 = vcmp.gt.f32.partialorder %v578_v31, 0.5 }
 0x173   : > { %v1716_v12 = vsel %vm972_vm8, %v1557_v33, -inf  ;;  %v1714_v14 = vsel %vm970_vm9, %v1557_v33, -inf  ;;  %855 = vbcast.lane.b32.xlu1 %v841_v59, 280  ;;  %847 = vbcast.lane.b32.xlu0 %v841_v59, 264 }
 0x174   : > { %v3363_v21 = vmax.f32 %v1860_v28, %v1716_v12  ;;  %v3365_v52 = vmax.f32 %v1798_v61, %v1714_v14  ;;  %2463 = vmatprep.subr.bf16.mxu0 %v2462_v54  ;;  %2505 = vmatprep.subr.bf16.mxu1 %v2462_v54  ;;  %v898_v61 = vrot.slane %v3302_v57, %v3110_v19 }
 0x175   : > { %v590_v22 = vpop.permute.xlu1 %589  ;;  %v582_v23 = vpop.permute.xlu0 %581  ;;  %2465 = vmatpush3.bf16.msra.mxu0 %v2462_v54  ;;  %2513 = vmatpush3.bf16.msra.mxu1 %v2462_v54 }
 0x176   : > { %vm973_vm10 = vcmp.gt.f32.partialorder %v590_v22, 0.5  ;;  %vm971_vm11 = vcmp.gt.f32.partialorder %v582_v23, 0.5 }
 0x177   : > { %v1717_v53 = vsel %vm973_vm10, %v1557_v33, -inf  ;;  %v1715_v16 = vsel %vm971_vm11, %v1557_v33, -inf  ;;  %870 = vbcast.lane.b32.xlu1 %v860_v45, 272  ;;  %862 = vbcast.lane.b32.xlu0 %v860_v45, 256  ;;  %v1569_v33 = vrot.slane %v1181_v63, %v3082_v4 }
 0x178   : > { %v3374_v30 = vmax.f32 %v1891_v7, %v1717_v53  ;;  %v3376_v35 = vmax.f32 %v1829_v10, %v1715_v16  ;;  %v1191_v53 = vcombine.high %v1181_v63, %v1181_v63  ;;  %v1144_v16 = vcombine.high %v3367_v34, %v3367_v34 }
 0x179   : > { %v605_v8 = vpop.permute.xlu1 %604  ;;  %v597_v51 = vpop.permute.xlu0 %596 }
 0x17a   : > { %vm976_vm12 = vcmp.gt.f32.partialorder %v605_v8, 0.5  ;;  %vm974_vm13 = vcmp.gt.f32.partialorder %v597_v51, 0.5  ;;  %v1577_v58 = vrot.slane %v1191_v53, %v3082_v4  ;;  %v1158_v2 = vrot.slane %v1144_v16, %v3154_v50  ;;  %v3409_v53 = vld [vmem:[#allocation2 + $0x18] sm:$0xff] }
 0x17b   : > { %v1720_v1 = vsel %vm976_vm12, %v1561_v18, -inf  ;;  %v1718_v26 = vsel %vm974_vm13, %v1561_v18, -inf  ;;  %874 = vbcast.lane.b32.xlu1 %v860_v45, 280  ;;  %866 = vbcast.lane.b32.xlu0 %v860_v45, 264 }
 0x17c   : > { %v1862_v11 = vmax.f32 %v3363_v21, %v1720_v1  ;;  %v1800_v42 = vmax.f32 %v3365_v52, %v1718_v26  ;;  %v1573_v21 = vrot.slane %v1189_v62, %v3082_v4 }
 0x17d   : > { %v609_v43 = vpop.permute.xlu1 %608  ;;  %v601_v29 = vpop.permute.xlu0 %600 }
 0x17e   : > { %vm977_vm14 = vcmp.gt.f32.partialorder %v609_v43, 0.5  ;;  %vm975_vm15 = vcmp.gt.f32.partialorder %v601_v29, 0.5 }
 0x17f   : > { %v1721_v55 = vsel %vm977_vm14, %v1561_v18, -inf  ;;  %v1719_v17 = vsel %vm975_vm15, %v1561_v18, -inf  ;;  %889 = vbcast.lane.b32.xlu1 %v879_v47, 272  ;;  %881 = vbcast.lane.b32.xlu0 %v879_v47, 256 }
 0x180   : > { %v1893_v56 = vmax.f32 %v3374_v30, %v1721_v55  ;;  %v1831_v25 = vmax.f32 %v3376_v35, %v1719_v17  ;;  %v1160_v17 = vcombine.high %v1158_v2, %v1158_v2 }
 0x181   : > { %v624_v41 = vpop.permute.xlu1 %623  ;;  %v616_v59 = vpop.permute.xlu0 %615 }
 0x182   : > { %vm980_vm0 = vcmp.gt.f32.partialorder %v624_v41, 0.5  ;;  %vm978_vm1 = vcmp.gt.f32.partialorder %v616_v59, 0.5 }
 0x183   : > { %v1724_v60 = vsel %vm980_vm0, %v1565_v27, -inf  ;;  %v1722_v28 = vsel %vm978_vm1, %v1565_v27, -inf  ;;  %893 = vbcast.lane.b32.xlu1 %v879_v47, 280  ;;  %885 = vbcast.lane.b32.xlu0 %v879_v47, 264 }
 0x184   : > { %v1863_v48 = vmax.f32 %v1862_v11, %v1724_v60  ;;  %v1801_v49 = vmax.f32 %v1800_v42, %v1722_v28  ;;  %v1174_v11 = vrot.slane %v1158_v2, %v3154_v50  ;;  %v1188_v60 = vrot.slane %v1160_v17, %v3154_v50 }
 0x185   : > { %v628_v3 = vpop.permute.xlu1 %627  ;;  %v620_v13 = vpop.permute.xlu0 %619 }
 0x186   : > { %vm981_vm2 = vcmp.gt.f32.partialorder %v628_v3, 0.5  ;;  %vm979_vm3 = vcmp.gt.f32.partialorder %v620_v13, 0.5  ;;  %v1581_v55 = vrot.slane %v1174_v11, %v3082_v4  ;;  %v1585_v13 = vrot.slane %v1188_v60, %v3082_v4 }
 0x187   : > { %v1725_v6 = vsel %vm981_vm2, %v1565_v27, -inf  ;;  %v1723_v5 = vsel %vm979_vm3, %v1565_v27, -inf  ;;  %908 = vbcast.lane.b32.xlu1 %v898_v61, 272  ;;  %900 = vbcast.lane.b32.xlu0 %v898_v61, 256 }
 0x188   : > { %v1894_v7 = vmax.f32 %v1893_v56, %v1725_v6  ;;  %v1832_v10 = vmax.f32 %v1831_v25, %v1723_v5 }
 0x189   : > { %v643_v37 = vpop.permute.xlu1 %642  ;;  %v635_v31 = vpop.permute.xlu0 %634 }
 0x18a   : > { %vm984_vm4 = vcmp.gt.f32.partialorder %v643_v37, 0.5  ;;  %vm982_vm5 = vcmp.gt.f32.partialorder %v635_v31, 0.5  ;;  %v1190_v31 = vcombine.high %v1174_v11, %v1174_v11 }
 0x18b   : > { %v1728_v19 = vsel %vm984_vm4, %v1569_v33, -inf  ;;  %v1726_v57 = vsel %vm982_vm5, %v1569_v33, -inf  ;;  %912 = vbcast.lane.b32.xlu1 %v898_v61, 280  ;;  %904 = vbcast.lane.b32.xlu0 %v898_v61, 264 }
 0x18c   : > { %v1864_v38 = vmax.f32 %v1863_v48, %v1728_v19  ;;  %v1802_v44 = vmax.f32 %v1801_v49, %v1726_v57 }
 0x18d   : > { %v647_v12 = vpop.permute.xlu1 %646  ;;  %v639_v14 = vpop.permute.xlu0 %638 }
 0x18e   : > { %vm985_vm6 = vcmp.gt.f32.partialorder %v647_v12, 0.5  ;;  %vm983_vm7 = vcmp.gt.f32.partialorder %v639_v14, 0.5  ;;  %v1589_v14 = vrot.slane %v1190_v31, %v3082_v4 }
 0x18f   : > { %v1729_v45 = vsel %vm985_vm6, %v1569_v33, -inf  ;;  %v1727_v20 = vsel %vm983_vm7, %v1569_v33, -inf }
 0x190   : > { %v1895_v52 = vmax.f32 %v1894_v7, %v1729_v45  ;;  %v1833_v22 = vmax.f32 %v1832_v10, %v1727_v20 }
 0x191   : > { %v662_v23 = vpop.permute.xlu1 %661  ;;  %v654_v36 = vpop.permute.xlu0 %653 }
 0x192   : > { %vm988_vm8 = vcmp.gt.f32.partialorder %v662_v23, 0.5  ;;  %vm986_vm9 = vcmp.gt.f32.partialorder %v654_v36, 0.5  ;;  %v1192_v36 = vcombine.high %v1188_v60, %v1188_v60 }
 0x193   : > { %v1732_v9 = vsel %vm988_vm8, %v1573_v21, -inf  ;;  %v1730_v15 = vsel %vm986_vm9, %v1573_v21, -inf }
 0x194   : > { %v1865_v18 = vmax.f32 %v1864_v38, %v1732_v9  ;;  %v1803_v24 = vmax.f32 %v1802_v44, %v1730_v15 }
 0x195   : > { %v666_v30 = vpop.permute.xlu1 %665  ;;  %v658_v35 = vpop.permute.xlu0 %657 }
 0x196   : > { %vm989_vm10 = vcmp.gt.f32.partialorder %v666_v30, 0.5  ;;  %vm987_vm11 = vcmp.gt.f32.partialorder %v658_v35, 0.5  ;;  %v1593_v35 = vrot.slane %v1192_v36, %v3082_v4 }
 0x197   : > { %v1733_v8 = vsel %vm989_vm10, %v1573_v21, -inf  ;;  %v1731_v51 = vsel %vm987_vm11, %v1573_v21, -inf }
 0x198   : > { %v1896_v0 = vmax.f32 %v1895_v52, %v1733_v8  ;;  %v1834_v1 = vmax.f32 %v1833_v22, %v1731_v51  ;;  %v1200_v8 = vrot.slane %v3409_v53, %v3154_v50 }
 0x199   : > { %v681_v26 = vpop.permute.xlu1 %680  ;;  %v673_v47 = vpop.permute.xlu0 %672 }
 0x19a   : > { %vm992_vm12 = vcmp.gt.f32.partialorder %v681_v26, 0.5  ;;  %vm990_vm13 = vcmp.gt.f32.partialorder %v673_v47, 0.5  ;;  %v1216_v47 = vrot.slane %v1200_v8, %v3154_v50 }
 0x19b   : > { %v1736_v39 = vsel %vm992_vm12, %v1577_v58, -inf  ;;  %v1734_v34 = vsel %vm990_vm13, %v1577_v58, -inf }
 0x19c   : > { %v1866_v42 = vmax.f32 %v1865_v18, %v1736_v39  ;;  %v1804_v43 = vmax.f32 %v1803_v24, %v1734_v34 }
 0x19d   : > { %v685_v29 = vpop.permute.xlu1 %684  ;;  %v677_v32 = vpop.permute.xlu0 %676 }
 0x19e   : > { %vm993_vm14 = vcmp.gt.f32.partialorder %v685_v29, 0.5  ;;  %vm991_vm15 = vcmp.gt.f32.partialorder %v677_v32, 0.5  ;;  %v1597_v32 = vrot.slane %v1216_v47, %v3082_v4 }
 0x19f   : > { %v1737_v46 = vsel %vm993_vm14, %v1577_v58, -inf  ;;  %v1735_v54 = vsel %vm991_vm15, %v1577_v58, -inf }
 0x1a0   : > { %v1897_v27 = vmax.f32 %v1896_v0, %v1737_v46  ;;  %v1835_v40 = vmax.f32 %v1834_v1, %v1735_v54  ;;  %v1208_v46 = vcombine.high %v1200_v8, %v1200_v8 }
 0x1a1   : > { %v700_v56 = vpop.permute.xlu1 %699  ;;  %v692_v25 = vpop.permute.xlu0 %691 }
 0x1a2   : > { %vm996_vm0 = vcmp.gt.f32.partialorder %v700_v56, 0.5  ;;  %vm994_vm1 = vcmp.gt.f32.partialorder %v692_v25, 0.5  ;;  %v1230_v25 = vrot.slane %v1208_v46, %v3154_v50 }
 0x1a3   : > { %v1740_v41 = vsel %vm996_vm0, %v1581_v55, -inf  ;;  %v1738_v59 = vsel %vm994_vm1, %v1581_v55, -inf }
 0x1a4   : > { %v1867_v28 = vmax.f32 %v1866_v42, %v1740_v41  ;;  %v1805_v61 = vmax.f32 %v1804_v43, %v1738_v59 }
 0x1a5   : > { %v704_v63 = vpop.permute.xlu1 %703  ;;  %v696_v48 = vpop.permute.xlu0 %695 }
 0x1a6   : > { %vm997_vm2 = vcmp.gt.f32.partialorder %v704_v63, 0.5  ;;  %vm995_vm3 = vcmp.gt.f32.partialorder %v696_v48, 0.5  ;;  %v1601_v48 = vrot.slane %v1230_v25, %v3082_v4 }
 0x1a7   : > { %v1741_v49 = vsel %vm997_vm2, %v1581_v55, -inf  ;;  %v1739_v3 = vsel %vm995_vm3, %v1581_v55, -inf }
 0x1a8   : > { %v1898_v6 = vmax.f32 %v1897_v27, %v1741_v49  ;;  %v1836_v5 = vmax.f32 %v1835_v40, %v1739_v3 }
 0x1a9   : > { %v719_v33 = vpop.permute.xlu1 %718  ;;  %v711_v7 = vpop.permute.xlu0 %710 }
 0x1aa   : > { %vm1000_vm4 = vcmp.gt.f32.partialorder %v719_v33, 0.5  ;;  %vm998_vm5 = vcmp.gt.f32.partialorder %v711_v7, 0.5  ;;  %v1238_v7 = vcombine.high %v1216_v47, %v1216_v47 }
 0x1ab   : > { %v1744_v10 = vsel %vm1000_vm4, %v1585_v13, -inf  ;;  %v1742_v37 = vsel %vm998_vm5, %v1585_v13, -inf }
 0x1ac   : > { %v1868_v19 = vmax.f32 %v1867_v28, %v1744_v10  ;;  %v1806_v57 = vmax.f32 %v1805_v61, %v1742_v37 }
 0x1ad   : > { %v723_v62 = vpop.permute.xlu1 %722  ;;  %v715_v38 = vpop.permute.xlu0 %714 }
 0x1ae   : > { %vm1001_vm6 = vcmp.gt.f32.partialorder %v723_v62, 0.5  ;;  %vm999_vm7 = vcmp.gt.f32.partialorder %v715_v38, 0.5  ;;  %v1605_v38 = vrot.slane %v1238_v7, %v3082_v4 }
 0x1af   : > { %v1745_v44 = vsel %vm1001_vm6, %v1585_v13, -inf  ;;  %v1743_v12 = vsel %vm999_vm7, %v1585_v13, -inf }
 0x1b0   : > { %v1899_v45 = vmax.f32 %v1898_v6, %v1745_v44  ;;  %v1837_v20 = vmax.f32 %v1836_v5, %v1743_v12 }
 0x1b1   : > { %v738_v21 = vpop.permute.xlu1 %737  ;;  %v730_v52 = vpop.permute.xlu0 %729 }
 0x1b2   : > { %vm1004_vm8 = vcmp.gt.f32.partialorder %v738_v21, 0.5  ;;  %vm1002_vm9 = vcmp.gt.f32.partialorder %v730_v52, 0.5  ;;  %v1240_v52 = vcombine.high %v1230_v25, %v1230_v25 }
 0x1b3   : > { %v1748_v22 = vsel %vm1004_vm8, %v1589_v14, -inf  ;;  %v1746_v23 = vsel %vm1002_vm9, %v1589_v14, -inf }
 0x1b4   : > { %v1869_v9 = vmax.f32 %v1868_v19, %v1748_v22  ;;  %v1807_v15 = vmax.f32 %v1806_v57, %v1746_v23  ;;  %v1193_v22 = vcombine.high %v3409_v53, %v3409_v53 }
 0x1b5   : > { %v742_v16 = vpop.permute.xlu1 %741  ;;  %v734_v18 = vpop.permute.xlu0 %733 }
 0x1b6   : > { %vm1005_vm10 = vcmp.gt.f32.partialorder %v742_v16, 0.5  ;;  %vm1003_vm11 = vcmp.gt.f32.partialorder %v734_v18, 0.5 }
 0x1b7   : > { %v1749_v24 = vsel %vm1005_vm10, %v1589_v14, -inf  ;;  %v1747_v30 = vsel %vm1003_vm11, %v1589_v14, -inf }
 0x1b8   : > { %v1900_v51 = vmax.f32 %v1899_v45, %v1749_v24  ;;  %v1838_v58 = vmax.f32 %v1837_v20, %v1747_v30  ;;  %v1609_v24 = vrot.slane %v1240_v52, %v3082_v4  ;;  %v1207_v30 = vrot.slane %v1193_v22, %v3154_v50 }
 0x1b9   : > { %v757_v2 = vpop.permute.xlu1 %756  ;;  %v749_v0 = vpop.permute.xlu0 %748 }
 0x1ba   : > { %vm1008_vm12 = vcmp.gt.f32.partialorder %v757_v2, 0.5  ;;  %vm1006_vm13 = vcmp.gt.f32.partialorder %v749_v0, 0.5  ;;  %v1223_v0 = vrot.slane %v1207_v30, %v3154_v50 }
 0x1bb   : > { %v1752_v1 = vsel %vm1008_vm12, %v1593_v35, -inf  ;;  %v1750_v26 = vsel %vm1006_vm13, %v1593_v35, -inf }
 0x1bc   : > { %v1870_v39 = vmax.f32 %v1869_v9, %v1752_v1  ;;  %v1808_v34 = vmax.f32 %v1807_v15, %v1750_v26 }
 0x1bd   : > { %v761_v11 = vpop.permute.xlu1 %760  ;;  %v753_v42 = vpop.permute.xlu0 %752 }
 0x1be   : > { %vm1009_vm14 = vcmp.gt.f32.partialorder %v761_v11, 0.5  ;;  %vm1007_vm15 = vcmp.gt.f32.partialorder %v753_v42, 0.5  ;;  %v1613_v42 = vrot.slane %v1223_v0, %v3082_v4 }
 0x1bf   : > { %v1753_v43 = vsel %vm1009_vm14, %v1593_v35, -inf  ;;  %v1751_v29 = vsel %vm1007_vm15, %v1593_v35, -inf }
 0x1c0   : > { %v1901_v54 = vmax.f32 %v1900_v51, %v1753_v43  ;;  %v1839_v55 = vmax.f32 %v1838_v58, %v1751_v29  ;;  %v1209_v43 = vcombine.high %v1207_v30, %v1207_v30 }
 0x1c1   : > { %v776_v17 = vpop.permute.xlu1 %775  ;;  %v768_v27 = vpop.permute.xlu0 %767 }
 0x1c2   : > { %vm1012_vm0 = vcmp.gt.f32.partialorder %v776_v17, 0.5  ;;  %vm1010_vm1 = vcmp.gt.f32.partialorder %v768_v27, 0.5  ;;  %v1237_v27 = vrot.slane %v1209_v43, %v3154_v50 }
 0x1c3   : > { %v1756_v40 = vsel %vm1012_vm0, %v1597_v32, -inf  ;;  %v1754_v56 = vsel %vm1010_vm1, %v1597_v32, -inf }
 0x1c4   : > { %v1871_v41 = vmax.f32 %v1870_v39, %v1756_v40  ;;  %v1809_v59 = vmax.f32 %v1808_v34, %v1754_v56 }
 0x1c5   : > { %v780_v60 = vpop.permute.xlu1 %779  ;;  %v772_v28 = vpop.permute.xlu0 %771 }
 0x1c6   : > { %vm1013_vm2 = vcmp.gt.f32.partialorder %v780_v60, 0.5  ;;  %vm1011_vm3 = vcmp.gt.f32.partialorder %v772_v28, 0.5  ;;  %v1617_v28 = vrot.slane %v1237_v27, %v3082_v4 }
 0x1c7   : > { %v1757_v61 = vsel %vm1013_vm2, %v1597_v32, -inf  ;;  %v1755_v63 = vsel %vm1011_vm3, %v1597_v32, -inf }
 0x1c8   : > { %v1902_v49 = vmax.f32 %v1901_v54, %v1757_v61  ;;  %v1840_v3 = vmax.f32 %v1839_v55, %v1755_v63 }
 0x1c9   : > { %v795_v13 = vpop.permute.xlu1 %794  ;;  %v787_v6 = vpop.permute.xlu0 %786 }
 0x1ca   : > { %vm1016_vm4 = vcmp.gt.f32.partialorder %v795_v13, 0.5  ;;  %vm1014_vm5 = vcmp.gt.f32.partialorder %v787_v6, 0.5  ;;  %v1239_v6 = vcombine.high %v1223_v0, %v1223_v0 }
 0x1cb   : > { %v1760_v5 = vsel %vm1016_vm4, %v1601_v48, -inf  ;;  %v1758_v33 = vsel %vm1014_vm5, %v1601_v48, -inf }
 0x1cc   : > { %v1872_v10 = vmax.f32 %v1871_v41, %v1760_v5  ;;  %v1810_v37 = vmax.f32 %v1809_v59, %v1758_v33 }
 0x1cd   : > { %v799_v31 = vpop.permute.xlu1 %798  ;;  %v791_v19 = vpop.permute.xlu0 %790 }
 0x1ce   : > { %vm1017_vm6 = vcmp.gt.f32.partialorder %v799_v31, 0.5  ;;  %vm1015_vm7 = vcmp.gt.f32.partialorder %v791_v19, 0.5  ;;  %v1621_v31 = vrot.slane %v1239_v6, %v3082_v4  ;;  %v2046_v6 = vld [vmem:[#allocation8 + $0x78] sm:$0xff] (!%p2310_p8) }
 0x1cf   : > { %v1761_v57 = vsel %vm1017_vm6, %v1601_v48, -inf  ;;  %v1759_v62 = vsel %vm1015_vm7, %v1601_v48, -inf }
 0x1d0   : > { %v1903_v44 = vmax.f32 %v1902_v49, %v1761_v57  ;;  %v1841_v12 = vmax.f32 %v1840_v3, %v1759_v62 }
 0x1d1   : > { %v814_v14 = vpop.permute.xlu1 %813  ;;  %v806_v45 = vpop.permute.xlu0 %805 }
 0x1d2   : > { %vm1020_vm8 = vcmp.gt.f32.partialorder %v814_v14, 0.5  ;;  %vm1018_vm9 = vcmp.gt.f32.partialorder %v806_v45, 0.5  ;;  %v1241_v14 = vcombine.high %v1237_v27, %v1237_v27  ;;  %v2029_v27 = vld [vmem:[#allocation2 + $0x10] sm:$0xff] (!%p2310_p8) }
 0x1d3   : > { %v1764_v20 = vsel %vm1020_vm8, %v1605_v38, -inf  ;;  %v1762_v21 = vsel %vm1018_vm9, %v1605_v38, -inf }
 0x1d4   : > { %v1873_v23 = vmax.f32 %v1872_v10, %v1764_v20  ;;  %v1811_v36 = vmax.f32 %v1810_v37, %v1762_v21 }
 0x1d5   : > { %v818_v9 = vpop.permute.xlu1 %817  ;;  %v810_v15 = vpop.permute.xlu0 %809 }
 0x1d6   : > { %vm1021_vm10 = vcmp.gt.f32.partialorder %v818_v9, 0.5  ;;  %vm1019_vm11 = vcmp.gt.f32.partialorder %v810_v15, 0.5 }
 0x1d7   : > { %v1765_v16 = vsel %vm1021_vm10, %v1605_v38, -inf  ;;  %v1763_v18 = vsel %vm1019_vm11, %v1605_v38, -inf }
 0x1d8   : > { %v1904_v35 = vmax.f32 %v1903_v44, %v1765_v16  ;;  %v1842_v8 = vmax.f32 %v1841_v12, %v1763_v18 }
 0x1d9   : > { %v833_v51 = vpop.permute.xlu1 %832  ;;  %v825_v58 = vpop.permute.xlu0 %824 }
 0x1da   : > { %vm1024_vm12 = vcmp.gt.f32.partialorder %v833_v51, 0.5  ;;  %vm1022_vm13 = vcmp.gt.f32.partialorder %v825_v58, 0.5 }
 0x1db   : > { %v1768_v2 = vsel %vm1024_vm12, %v1609_v24, -inf  ;;  %v1766_v53 = vsel %vm1022_vm13, %v1609_v24, -inf }
 0x1dc   : > { %v1874_v1 = vmax.f32 %v1873_v23, %v1768_v2  ;;  %v1812_v26 = vmax.f32 %v1811_v36, %v1766_v53  ;;  %v1625_v36 = vrot.slane %v1241_v14, %v3082_v4 }
 0x1dd   : > { %v837_v47 = vpop.permute.xlu1 %836  ;;  %v829_v39 = vpop.permute.xlu0 %828 }
 0x1de   : > { %vm1025_vm14 = vcmp.gt.f32.partialorder %v837_v47, 0.5  ;;  %vm1023_vm15 = vcmp.gt.f32.partialorder %v829_v39, 0.5 }
 0x1df   : > { %v1769_v34 = vsel %vm1025_vm14, %v1609_v24, -inf  ;;  %v1767_v11 = vsel %vm1023_vm15, %v1609_v24, -inf }
 0x1e0   : > { %v1905_v29 = vmax.f32 %v1904_v35, %v1769_v34  ;;  %v1843_v32 = vmax.f32 %v1842_v8, %v1767_v11  ;;  %v2031_v34 = vld [vmem:[#allocation8] sm:$0xff] (!%p2310_p8)  ;;  %v2032_v11 = vld [vmem:[#allocation8 + $0x8] sm:$0xff] (!%p2310_p8) }
 0x1e1   : > { %v852_v46 = vpop.permute.xlu1 %851  ;;  %v844_v54 = vpop.permute.xlu0 %843  ;;  %v2466_v43 = vpack.c.bf16 (!%p2310_p8), %v2032_v11, %v2031_v34 }
 0x1e2   : > { %vm1028_vm0 = vcmp.gt.f32.partialorder %v852_v46, 0.5  ;;  %vm1026_vm1 = vcmp.gt.f32.partialorder %v844_v54, 0.5  ;;  %v2035_v46 = vld [vmem:[#allocation8 + $0x20] sm:$0xff] (!%p2310_p8)  ;;  %v2036_v54 = vld [vmem:[#allocation8 + $0x28] sm:$0xff] (!%p2310_p8) }
 0x1e3   : > { %v1772_v55 = vsel %vm1028_vm0, %v1613_v42, -inf  ;;  %v1770_v17 = vsel %vm1026_vm1, %v1613_v42, -inf  ;;  %2467 = vmatprep.subr.bf16.mxu0 (!%p2310_p8), %v2466_v43  ;;  %2514 = vmatprep.subr.bf16.mxu1 (!%p2310_p8), %v2466_v43 }
 0x1e4   : > { %v1875_v40 = vmax.f32 %v1874_v1, %v1772_v55  ;;  %v1813_v56 = vmax.f32 %v1812_v26, %v1770_v17  ;;  %v2474_v55 = vpack.c.bf16 (!%p2310_p8), %v2036_v54, %v2035_v46  ;;  %v2027_v17 = vld [vmem:[#allocation2] sm:$0xff] (!%p2310_p8) }
 0x1e5   : > { %v856_v25 = vpop.permute.xlu1 %855  ;;  %v848_v41 = vpop.permute.xlu0 %847 }
 0x1e6   : > { %vm1029_vm2 = vcmp.gt.f32.partialorder %v856_v25, 0.5  ;;  %vm1027_vm3 = vcmp.gt.f32.partialorder %v848_v41, 0.5  ;;  %v2039_v41 = vld [vmem:[#allocation8 + $0x40] sm:$0xff] (!%p2310_p8) }
 0x1e7   : > { %v1773_v59 = vsel %vm1029_vm2, %v1613_v42, -inf  ;;  %v1771_v60 = vsel %vm1027_vm3, %v1613_v42, -inf  ;;  %v2033_v42 = vld [vmem:[#allocation8 + $0x10] sm:$0xff] (!%p2310_p8) }
 0x1e8   : > { %v1906_v61 = vmax.f32 %v1905_v29, %v1773_v59  ;;  %v1844_v63 = vmax.f32 %v1843_v32, %v1771_v60  ;;  %v2034_v29 = vld [vmem:[#allocation8 + $0x18] sm:$0xff] (!%p2310_p8)  ;;  %v2040_v59 = vld [vmem:[#allocation8 + $0x48] sm:$0xff] (!%p2310_p8) }
 0x1e9   : > { %v871_v48 = vpop.permute.xlu1 %870  ;;  %v863_v49 = vpop.permute.xlu0 %862  ;;  %v2470_v32 = vpack.c.bf16 (!%p2310_p8), %v2034_v29, %v2033_v42  ;;  %v2482_v60 = vpack.c.bf16 (!%p2310_p8), %v2040_v59, %v2039_v41 }
 0x1ea   : > { %vm1032_vm4 = vcmp.gt.f32.partialorder %v871_v48, 0.5  ;;  %vm1030_vm5 = vcmp.gt.f32.partialorder %v863_v49, 0.5  ;;  %v2043_v48 = vld [vmem:[#allocation8 + $0x60] sm:$0xff] (!%p2310_p8)  ;;  %v2044_v49 = vld [vmem:[#allocation8 + $0x68] sm:$0xff] (!%p2310_p8) }
 0x1eb   : > { %v1776_v3 = vsel %vm1032_vm4, %v1617_v28, -inf  ;;  %v1774_v13 = vsel %vm1030_vm5, %v1617_v28, -inf }
 0x1ec   : > { %v1876_v50 = vmax.f32 %v1875_v40, %v1776_v3  ;;  %v1814_v5 = vmax.f32 %v1813_v56, %v1774_v13  ;;  %v2037_v40 = vld [vmem:[#allocation8 + $0x30] sm:$0xff] (!%p2310_p8)  ;;  %v2038_v56 = vld [vmem:[#allocation8 + $0x38] sm:$0xff] (!%p2310_p8)  ;;  %v2490_v3 = vpack.c.bf16 (!%p2310_p8), %v2044_v49, %v2043_v48 }
 0x1ed   : > { %v875_v33 = vpop.permute.xlu1 %874  ;;  %v867_v7 = vpop.permute.xlu0 %866  ;;  %v2478_v25 = vpack.c.bf16 (!%p2310_p8), %v2038_v56, %v2037_v40  ;;  %v2045_v13 = vld [vmem:[#allocation8 + $0x70] sm:$0xff] (!%p2310_p8) }
 0x1ee   : > { %vm1033_vm6 = vcmp.gt.f32.partialorder %v875_v33, 0.5  ;;  %vm1031_vm7 = vcmp.gt.f32.partialorder %v867_v7, 0.5  ;;  %v2030_v33 = vld [vmem:[#allocation2 + $0x18] sm:$0xff] (!%p2310_p8)  ;;  %v2311_v7 = vld [vmem:[%s3496_s4] ss:$0 sm:$0xff] (!%p2310_p8) }
 0x1ef   : > { %v1777_v10 = vsel %vm1033_vm6, %v1617_v28, -inf  ;;  %v1775_v37 = vsel %vm1031_vm7, %v1617_v28, -inf  ;;  %v2041_v28 = vld [vmem:[#allocation8 + $0x50] sm:$0xff] (!%p2310_p8) }
 0x1f0   : > { %v1907_v19 = vmax.f32 %v1906_v61, %v1777_v10  ;;  %v1845_v57 = vmax.f32 %v1844_v63, %v1775_v37  ;;  %v2042_v61 = vld [vmem:[#allocation8 + $0x58] sm:$0xff] (!%p2310_p8) }
 0x1f1   : > { %v890_v62 = vpop.permute.xlu1 %889  ;;  %v882_v38 = vpop.permute.xlu0 %881  ;;  %v2486_v63 = vpack.c.bf16 (!%p2310_p8), %v2042_v61, %v2041_v28 }
 0x1f2   : > { %vm1036_vm8 = vcmp.gt.f32.partialorder %v890_v62, 0.5  ;;  %vm1034_vm9 = vcmp.gt.f32.partialorder %v882_v38, 0.5 }
 0x1f3   : > { %v1780_v44 = vsel %vm1036_vm8, %v1621_v31, -inf  ;;  %v1778_v12 = vsel %vm1034_vm9, %v1621_v31, -inf }
 0x1f4   : > { %v1877_v45 = vmax.f32 %v1876_v50, %v1780_v44  ;;  %v1815_v20 = vmax.f32 %v1814_v5, %v1778_v12  ;;  %v2494_v50 = vpack.c.bf16 (!%p2310_p8), %v2046_v6, %v2045_v13  ;;  %v2028_v5 = vld [vmem:[#allocation2 + $0x8] sm:$0xff] (!%p2310_p8) }
 0x1f5   : > { %v894_v21 = vpop.permute.xlu1 %893  ;;  %v886_v52 = vpop.permute.xlu0 %885 }
 0x1f6   : > { %vm1037_vm10 = vcmp.gt.f32.partialorder %v894_v21, 0.5  ;;  %vm1035_vm11 = vcmp.gt.f32.partialorder %v886_v52, 0.5 }
 0x1f7   : > { %v1781_v22 = vsel %vm1037_vm10, %v1621_v31, -inf  ;;  %v1779_v23 = vsel %vm1035_vm11, %v1621_v31, -inf }
 0x1f8   : > { %v1908_v9 = vmax.f32 %v1907_v19, %v1781_v22  ;;  %v1846_v15 = vmax.f32 %v1845_v57, %v1779_v23 }
 0x1f9   : > { %v909_v16 = vpop.permute.xlu1 %908  ;;  %v901_v18 = vpop.permute.xlu0 %900 }
 0x1fa   : > { %vm1040_vm12 = vcmp.gt.f32.partialorder %v909_v16, 0.5  ;;  %vm1038_vm13 = vcmp.gt.f32.partialorder %v901_v18, 0.5 }
 0x1fb   : > { %v1784_v24 = vsel %vm1040_vm12, %v1625_v36, -inf  ;;  %v1782_v30 = vsel %vm1038_vm13, %v1625_v36, -inf }
 0x1fc   : > { %v1816_v35 = vmax.f32 %v1815_v20, %v1782_v30  ;;  %v1878_v8 = vmax.f32 %v1877_v45, %v1784_v24 }
 0x1fd   : > { %v913_v51 = vpop.permute.xlu1 %912  ;;  %v905_v58 = vpop.permute.xlu0 %904 }
 0x1fe   : > { %vm1041_vm14 = vcmp.gt.f32.partialorder %v913_v51, 0.5  ;;  %vm1039_vm15 = vcmp.gt.f32.partialorder %v905_v58, 0.5  ;;  %vm1910_vm0 = vcmp.eq.f32.partialorder %v1816_v35, -inf  ;;  %vm1912_vm1 = vcmp.eq.f32.partialorder %v1878_v8, -inf }
 0x1ff   : > { %v1785_v2 = vsel %vm1041_vm14, %v1625_v36, -inf  ;;  %v1783_v53 = vsel %vm1039_vm15, %v1625_v36, -inf  ;;  %vm2302_vm2 = vmneg %vm1910_vm0 }
 0x200   : > { %v1909_v4 = vmax.f32 %v1908_v9, %v1785_v2  ;;  %v1847_v0 = vmax.f32 %v1846_v15, %v1783_v53  ;;  %2390 = vmatprep.mubr.msk.f32.mxu0 %vm2302_vm2, %v1816_v35  ;;  %vm2306_vm3 = vmneg %vm1912_vm1 }
 0x201   : > { %2393 = vmatprep.mubr.msk.f32.mxu1 %vm2306_vm3, %v1878_v8 }
 0x202   : > { %vm1911_vm4 = vcmp.eq.f32.partialorder %v1847_v0, -inf  ;;  %vm1913_vm5 = vcmp.eq.f32.partialorder %v1909_v4, -inf }
 0x203   : > { %vm2304_vm6 = vmneg %vm1911_vm4 }
 0x204   : > { %2391 = vmatmul.mubr.msk.f32.vlgmr.msra.gmra.mrb[0].mxu0 %vm2304_vm6, %v1847_v0  ;;  %vm2308_vm7 = vmneg %vm1913_vm5 }
 0x205   : > { %2394 = vmatmul.mubr.msk.f32.vlgmr.msra.gmra.mrb[0].mxu1 %vm2308_vm7, %v1909_v4  ;;  %2469 = vmatpush3.bf16.msra.mxu0 (!%p2310_p8), %v2466_v43 }
 0x206   : > { %2522 = vmatpush3.bf16.msra.mxu1 (!%p2310_p8), %v2466_v43  ;;  %2471 = vmatprep.subr.bf16.mxu0 (!%p2310_p8), %v2470_v32 }
 0x207   : > { %2515 = vmatprep.subr.bf16.mxu1 (!%p2310_p8), %v2470_v32  ;;  %2428 = vmatprep.mubr.f32.mxu0 (!%p2310_p8), %v2027_v17 }
 0x208   : > { %2431 = vmatprep.mubr.f32.mxu1 (!%p2310_p8), %v2029_v27 }
 0x209   : > { %2473 = vmatpush3.bf16.msra.mxu0 (!%p2310_p8), %v2470_v32 }
 0x20a   : > { %2523 = vmatpush3.bf16.msra.mxu1 (!%p2310_p8), %v2470_v32  ;;  %2475 = vmatprep.subr.bf16.mxu0 (!%p2310_p8), %v2474_v55 }
 0x20b   : > { %2516 = vmatprep.subr.bf16.mxu1 (!%p2310_p8), %v2474_v55 }
 0x20d   : > { %2477 = vmatpush3.bf16.msra.mxu0 (!%p2310_p8), %v2474_v55 }
 0x20e   : > { %2524 = vmatpush3.bf16.msra.mxu1 (!%p2310_p8), %v2474_v55  ;;  %2479 = vmatprep.subr.bf16.mxu0 (!%p2310_p8), %v2478_v25 }
 0x20f   : > { %2517 = vmatprep.subr.bf16.mxu1 (!%p2310_p8), %v2478_v25 }
 0x211   : > { %2481 = vmatpush3.bf16.msra.mxu0 (!%p2310_p8), %v2478_v25 }
 0x212   : > { %2525 = vmatpush3.bf16.msra.mxu1 (!%p2310_p8), %v2478_v25  ;;  %2483 = vmatprep.subr.bf16.mxu0 (!%p2310_p8), %v2482_v60 }
 0x213   : > { %2518 = vmatprep.subr.bf16.mxu1 (!%p2310_p8), %v2482_v60 }
 0x215   : > { %2485 = vmatpush3.bf16.msra.mxu0 (!%p2310_p8), %v2482_v60 }
 0x216   : > { %2526 = vmatpush3.bf16.msra.mxu1 (!%p2310_p8), %v2482_v60  ;;  %2487 = vmatprep.subr.bf16.mxu0 (!%p2310_p8), %v2486_v63 }
 0x217   : > { %2519 = vmatprep.subr.bf16.mxu1 (!%p2310_p8), %v2486_v63 }
 0x219   : > { %2489 = vmatpush3.bf16.msra.mxu0 (!%p2310_p8), %v2486_v63 }
 0x21a   : > { %2527 = vmatpush3.bf16.msra.mxu1 (!%p2310_p8), %v2486_v63  ;;  %2491 = vmatprep.subr.bf16.mxu0 (!%p2310_p8), %v2490_v3 }
 0x21b   : > { %2520 = vmatprep.subr.bf16.mxu1 (!%p2310_p8), %v2490_v3 }
 0x21d   : > { %2493 = vmatpush3.bf16.msra.mxu0 (!%p2310_p8), %v2490_v3 }
 0x21e   : > { %2528 = vmatpush3.bf16.msra.mxu1 (!%p2310_p8), %v2490_v3  ;;  %2495 = vmatprep.subr.bf16.mxu0 (!%p2310_p8), %v2494_v50 }
 0x21f   : > { %2521 = vmatprep.subr.bf16.mxu1 (!%p2310_p8), %v2494_v50 }
 0x221   : > { %2497 = vmatpush3.bf16.msra.mxu0 (!%p2310_p8), %v2494_v50 }
 0x222   : > { %2529 = vmatpush3.bf16.msra.mxu1 (!%p2310_p8), %v2494_v50 }
 0x2d3   : > { %2024 = sbr.rel (%p2310_p8) target bundleno = 947 (0x3b3), region = 60 }
 0x2d7   : > { %v3429_v1 = vpop.f32.mrb[0].mxu0 }
 0x2d8   : > { %v3431_v26 = vpop.f32.mrb[0].mxu1  ;;  %v3433_v47 = vpop.f32.mrb[1].mxu0  ;;  %2429 = vmatmul.mubr.f32.vlgmr.msra.gmra.mrb[0].mxu0 (!%p2310_p8), %v2028_v5 }
 0x2d9   : > { %v3435_v39 = vpop.f32.mrb[1].mxu1  ;;  %2432 = vmatmul.mubr.f32.vlgmr.msra.gmra.mrb[0].mxu1 (!%p2310_p8), %v2030_v33 }
 0x3ab   : > { %v2430_v10 = vpop.f32.mrb[0].mxu0 }
 0x3ac   : > { %v2433_v37 = vpop.f32.mrb[0].mxu1  ;;  %v2126_v31 = vadd.f32 %v2430_v10, %v2311_v7  ;;  %v2120_v57 = vpop.f32.mrb[1].mxu0 }
 0x3ad   : > { %v2136_v19 = vadd.f32 %v2433_v37, %v2311_v7  ;;  %v2130_v62 = vpop.f32.mrb[1].mxu1  ;;  %v2121_v38 = vadd.f32 %v2311_v7, %v2120_v57 }
 0x3ae   : > { %v2131_v44 = vadd.f32 %v2311_v7, %v2130_v62  ;;  %v2140_v12 = vadd.f32 %v3429_v1, %v2126_v31 }
 0x3af   : > { %v2142_v14 = vadd.f32 %v3431_v26, %v2136_v19  ;;  %v2139_v45 = vadd.f32 %v2121_v38, %v3433_v47 }
 0x3b0   : > { %v2141_v20 = vadd.f32 %v2131_v44, %v3435_v39  ;;  %2144 = vst [vmem:[#allocation10 + $0x8] sm:$0xff] %v2140_v12 }
 0x3b1   : > { %2146 = vst [vmem:[#allocation10 + $0x18] sm:$0xff] %v2142_v14  ;;  %2143 = vst [vmem:[#allocation10] sm:$0xff] %v2139_v45 }
 0x3b2   : > { %2145 = vst [vmem:[#allocation10 + $0x10] sm:$0xff] %v2141_v20 }
 0x3b3 PF: > { %p2312_p10 = scmp.le.s32.totalorder %s2830_s21, 0 }
 0x3b5   : > { %2150 = sbr.rel (%p2312_p10) target bundleno = 957 (0x3bd), region = 64 }
 0x3b7   : > { %v2152_v52 = vld [vmem:[#allocation10 + $0x8] sm:$0xff] (!%p2312_p10) }
 0x3b8   : > { %v2151_v21 = vld [vmem:[#allocation10] sm:$0xff] (!%p2312_p10)  ;;  %v2156_v36 = vadd.f32 (!%p2312_p10), %v3429_v1, %v2152_v52  ;;  %v2154_v15 = vld [vmem:[#allocation10 + $0x18] sm:$0xff] (!%p2312_p10) }
 0x3b9   : > { %v2153_v22 = vld [vmem:[#allocation10 + $0x10] sm:$0xff] (!%p2312_p10)  ;;  %v2155_v23 = vadd.f32 (!%p2312_p10), %v2151_v21, %v3433_v47  ;;  %v2158_v16 = vadd.f32 (!%p2312_p10), %v3431_v26, %v2154_v15 }
 0x3ba   : > { %v2157_v9 = vadd.f32 (!%p2312_p10), %v2153_v22, %v3435_v39  ;;  %2160 = vst [vmem:[#allocation10 + $0x8] sm:$0xff] (!%p2312_p10), %v2156_v36 }
 0x3bb   : > { %2159 = vst [vmem:[#allocation10] sm:$0xff] (!%p2312_p10), %v2155_v23  ;;  %2162 = vst [vmem:[#allocation10 + $0x18] sm:$0xff] (!%p2312_p10), %v2158_v16 }
 0x3bc   : > { %2161 = vst [vmem:[#allocation10 + $0x10] sm:$0xff] %v2157_v9 }
 0x3bd PF: > { %p2313_p11 = scmp.ne.s32.totalorder %s2830_s21, 3 }
 0x3bf   : > { %2166 = sbr.rel (%p2313_p11) target bundleno = 968 (0x3c8), region = 68 }
 0x3c2   : > { %v2168_v24 = vld [vmem:[#allocation10 + $0x8] sm:$0xff] (!%p2313_p11) }
 0x3c3   : > { %v2167_v18 = vld [vmem:[#allocation10] sm:$0xff] (!%p2313_p11)  ;;  %v2169_v30 = vld [vmem:[#allocation10 + $0x10] sm:$0xff] (!%p2313_p11)  ;;  %v2172_v8 = vmax.f32 (!%p2313_p11), %v2168_v24, 0.0  ;;  %v2170_v58 = vld [vmem:[#allocation10 + $0x18] sm:$0xff] (!%p2313_p11) }
 0x3c4   : > { %v2171_v35 = vmax.f32 (!%p2313_p11), %v2167_v18, 0.0  ;;  %v2173_v51 = vmax.f32 (!%p2313_p11), %v2169_v30, 0.0  ;;  %v2174_v2 = vmax.f32 (!%p2313_p11), %v2170_v58, 0.0 }
 0x3c5   : > { %2176 = vst [vmem:[#allocation10 + $0x8] sm:$0xff] (!%p2313_p11), %v2172_v8 }
 0x3c6   : > { %2175 = vst [vmem:[#allocation10] sm:$0xff] %v2171_v35  ;;  %2177 = vst [vmem:[#allocation10 + $0x10] sm:$0xff] %v2173_v51 }
 0x3c7   : > { %2178 = vst [vmem:[#allocation10 + $0x18] sm:$0xff] %v2174_v2 }
 0x3c8 PF: > { %p2569_p13 = scmp.eq.s32.totalorder %s2909_s24, 3  ;;  %s2847_s15 = smov [#allocation10]  }
 0x3c9   : > { %s2188_s27 = sshll.u32 %s2847_s15, 4  ;;  %s2189_s27 = int_to_ptr.vmem [resolvable:$true] %s2188_s27 }
 0x3ca   : > { %s2746_s21 = scalar_lea.vmem %s2189_s27, 512  ;;  %p2753_p12 = scmp.lt.s32.totalorder %s2189_s27, %s2189_s27 }
 0x3cb   : > { %p2747_p2 = scmp.ne.s32.totalorder %s2189_s27, %s2746_s21  ;;  %p2754_p6 = scmp.lt.s32.totalorder %s2746_s21, %s2746_s21 }
 0x3cd   : > { %p2748_p3 = pnand %p2747_p2, %p2569_p13  ;;  %p2755_p9 = por %p2754_p6, %p2753_p12 }
 0x3cf   : > { %p2749_p0 = pneg %p2748_p3 }
 0x3d1   : > { %p2756_p7 = pnand %p2755_p9, %p2749_p0 }
 0x3d3   : > { %2759 = shalt.err (!%p2756_p7)
}
 0x3d4   : > { %s2760_s18 = scalar_lea.hbm %s3497_s5, 512 }
 0x3d5   : > { %p2761_p1 = scmp.ne.s32.totalorder %s3497_s5, %s2760_s18  ;;  %p2766_p8 = scmp.lt.u32.totalorder %s2760_s18, %s3497_s5 }
 0x3d7   : > { %p2762_p4 = pnand %p2761_p1, %p2569_p13 }
 0x3d9   : > { %p2763_p5 = pneg %p2762_p4 }
 0x3db   : > { %p2768_p10 = pnand %p2766_p8, %p2763_p5 }
 0x3dd   : > { %2771 = shalt.err (!%p2768_p10)
}
 0x3de   : > { %s2848_s6 = smov 128   ;;  %s2849_s28 = smov 8  }
 0x3df   : > { %2545 = dma.vmem_to_hbm [thread:$0]  (%p2569_p13), %s2189_s27, 512, %s3497_s5, [#allocation4], %s2848_s6, %s2848_s6, %s2849_s28  }
 0x3e0   : > { %2813 = dma.done.wait (%p2569_p13), [#allocation4], 512  }
 0x3e1   : > { %2815 = vsyncadd (%p2569_p13), [#allocation4], 4294966784 }
 0x3e2 PF: > { %s21_s23 = sadd.s32 1, %s2838_s23   ;;  %s3514_s18 = smov %s2822_s19 }
 0x3e3   : > { %p18_p11 = scmp.ge.s32.totalorder %s21_s23, 6   ;;  %s3515_s19 = smov %s2826_s20 }
 0x3e4   : > { %s3516_s20 = smov %s3016_s10  ;;  %s3517_s21 = smov %s2834_s22 }
 0x3e5   : > { %s3518_s22 = smov %s3520_s29  ;;  %20 = sbr.rel (!%p18_p11) target bundleno = 7 (0x7), region = 105 }
 0x3ec   :  { %2204 = vsyncpa [#allocation3], 1 }
 0x3ed   :  { %2206 = vsyncpa [#allocation3 + $0x1], 1 }
 0x3ee   :  { %2207 = vsyncpa [#allocation6], 1 }
 0x3ef   :  { %2209 = vsyncpa [#allocation6 + $0x1], 1 }
 0x3f0   :  { %2210 = vsyncpa [#allocation9], 1 }
 0x3f1   :  { %2211 = vsyncpa [#allocation4], 1 }
 0x3f2   :  { %2213 = vsyncpa [#allocation4 + $0x1], 1 }

</bundles_post_ra>
